<compile_context>
chip_gen: v5e
topology: v5e:2x2
jax: 0.10.0
libtpu: 0.0.40
codegen_flags: <defaults>
</compile_context>

<pallas_src>
import functools

import jax
import jax.numpy as jnp
from jax import lax
from jax.experimental import pallas as pl
from jax.experimental.pallas import tpu as pltpu


# ---------------------------------------------------------------------------
# In-kernel math helpers (f32 elementwise)
# ---------------------------------------------------------------------------
def _layer_norm(x, g, b, eps=1e-5):
    # PyTorch nn.LayerNorm: biased variance, eps inside sqrt.
    mu = jnp.mean(x, axis=-1, keepdims=True)
    var = jnp.mean((x - mu) ** 2, axis=-1, keepdims=True)
    return (x - mu) * lax.rsqrt(var + eps) * g + b


def _gelu_exact(x):
    # PyTorch nn.GELU() default: exact erf formulation.
    return 0.5 * x * (1.0 + lax.erf(x * 0.7071067811865476))


# dot_general dimension numbers, single leading batch dim (= batch B)
_DN_B_NN = (((2,), (2,)), ((0,), (0,)))   # (B,N,d) x (B,M,d) -> (B,N,M)
_DN_B_ND = (((2,), (1,)), ((0,), (0,)))   # (B,N,M) x (B,M,d) -> (B,N,d)


# ---------------------------------------------------------------------------
# Pallas kernel: ONE transformer layer (full batch) per grid step.
# grid = (depth,); x carried across layers in the VMEM scratch x_acc.
# ---------------------------------------------------------------------------
def _block_kernel(x_ref, ln1g_ref, ln1b_ref, wqkv_ref, wout_ref, bout_ref,
                  ln2g_ref, ln2b_ref, w1_ref, b1_ref, w2_ref, b2_ref,
                  ng_ref, nb_ref, o_ref, x_acc,
                  *, batch, seq, dim, heads, dim_head):
    layer = pl.program_id(0)
    n_layers = pl.num_programs(0)
    B, N, D = batch, seq, dim
    BN = B * N
    dh = dim_head
    inner = heads * dh

    @pl.when(layer == 0)
    def _():
        # (B, N, D) -> (B*N, D): minor dim unchanged, safe reshape.
        x_acc[...] = x_ref[...].reshape(BN, D)

    x = x_acc[...]                                              # (BN, D) f32

    # ---------------- Attention block (pre-LN) ----------------
    # 1/sqrt(dh) is baked into the Q columns of wqkv (weight prep).
    h = _layer_norm(x, ln1g_ref[0], ln1b_ref[0])                # f32
    qkv = jnp.dot(h.astype(jnp.bfloat16), wqkv_ref[0],
                  preferred_element_type=jnp.float32)           # (BN, 3*inner)
    qkv = qkv.astype(jnp.bfloat16)                              # bf16 intermediates

    av_heads = []
    for hd in range(heads):                                     # static unroll
        qh = qkv[:, hd * dh:(hd + 1) * dh].reshape(B, N, dh)
        kh = qkv[:, inner + hd * dh: inner + (hd + 1) * dh].reshape(B, N, dh)
        vh = qkv[:, 2 * inner + hd * dh: 2 * inner + (hd + 1) * dh].reshape(B, N, dh)
        s = lax.dot_general(qh, kh, _DN_B_NN,
                            preferred_element_type=jnp.float32)  # (B, N, N) f32
        s = s - jnp.max(s, axis=-1, keepdims=True)
        e = jnp.exp(s)
        p = (e / jnp.sum(e, axis=-1, keepdims=True)).astype(jnp.bfloat16)
        av_heads.append(
            lax.dot_general(p, vh, _DN_B_ND,
                            preferred_element_type=jnp.float32))  # (B, N, dh)

    av = jnp.concatenate(av_heads, axis=-1)                      # (B, N, inner)
    av = av.reshape(BN, inner).astype(jnp.bfloat16)
    attn_out = jnp.dot(av, wout_ref[0],
                       preferred_element_type=jnp.float32) + bout_ref[0]
    x = attn_out + x                                             # residual

    # ---------------- FeedForward block (pre-LN) ----------------
    h = _layer_norm(x, ln2g_ref[0], ln2b_ref[0])
    h1 = jnp.dot(h.astype(jnp.bfloat16), w1_ref[0],
                 preferred_element_type=jnp.float32) + b1_ref[0]
    h1 = _gelu_exact(h1)
    h2 = jnp.dot(h1.astype(jnp.bfloat16), w2_ref[0],
                 preferred_element_type=jnp.float32) + b2_ref[0]
    x = h2 + x                                                   # residual

    x_acc[...] = x

    # ---------------- Final LayerNorm, written once ----------------
    @pl.when(layer == n_layers - 1)
    def _():
        y = _layer_norm(x, ng_ref[0], nb_ref[0])
        # NOTE: for production D should be padded to a multiple of 128 so this
        # single final store is lane-dense; at D=32 it is a one-time tiny write.
        o_ref[...] = y.reshape(B, N, D)


# ---------------------------------------------------------------------------
# One-time weight prep (hoisted out of the per-call wrapper): bf16 casts,
# reshapes, and the 1/sqrt(dh) scale folded into the Q columns of wqkv.
# ---------------------------------------------------------------------------
def prepare_params(params, *, depth, heads, dim_head):
    inner = heads * dim_head
    D = params["wqkv"].shape[1]
    mlp_dim = params["w1"].shape[-1]
    scale = dim_head ** (-0.5)

    wqkv = params["wqkv"]
    wqkv = jnp.concatenate([wqkv[:, :, :inner] * scale, wqkv[:, :, inner:]],
                           axis=-1)
    return {
        "wqkv": wqkv.astype(jnp.bfloat16),                      # (depth, D, 3*inner)
        "wout": params["wout"].astype(jnp.bfloat16),            # (depth, inner, D)
        "w1": params["w1"].astype(jnp.bfloat16),                # (depth, D, mlp)
        "w2": params["w2"].astype(jnp.bfloat16),                # (depth, mlp, D)
        "ln1g": params["ln1g"].reshape(depth, 1, D),
        "ln1b": params["ln1b"].reshape(depth, 1, D),
        "ln2g": params["ln2g"].reshape(depth, 1, D),
        "ln2b": params["ln2b"].reshape(depth, 1, D),
        "bout": params["bout"].reshape(depth, 1, D),
        "b1": params["b1"].reshape(depth, 1, mlp_dim),
        "b2": params["b2"].reshape(depth, 1, D),
        "norm_g": params["norm_g"].reshape(1, D),
        "norm_b": params["norm_b"].reshape(1, D),
    }


# ---------------------------------------------------------------------------
# Wrapper: BlockSpecs / grid / VMEM budget / cost estimate
# ---------------------------------------------------------------------------
def transformer_block_pallas(x, prepped, *, depth, heads, dim_head):
    B, N, D = x.shape
    inner = heads * dim_head
    mlp_dim = prepped["w1"].shape[-1]

    def per_layer_spec(arr):
        zeros = (0,) * (arr.ndim - 1)
        return pl.BlockSpec((1,) + arr.shape[1:],
                            lambda l, _z=zeros: (l,) + _z)

    in_specs = [
        pl.BlockSpec((B, N, D), lambda l: (0, 0, 0)),            # x (fetched once)
        per_layer_spec(prepped["ln1g"]), per_layer_spec(prepped["ln1b"]),
        per_layer_spec(prepped["wqkv"]), per_layer_spec(prepped["wout"]),
        per_layer_spec(prepped["bout"]),
        per_layer_spec(prepped["ln2g"]), per_layer_spec(prepped["ln2b"]),
        per_layer_spec(prepped["w1"]), per_layer_spec(prepped["b1"]),
        per_layer_spec(prepped["w2"]), per_layer_spec(prepped["b2"]),
        pl.BlockSpec((1, D), lambda l: (0, 0)),                  # final norm gamma
        pl.BlockSpec((1, D), lambda l: (0, 0)),                  # final norm beta
    ]

    kernel = functools.partial(_block_kernel, batch=B, seq=N, dim=D,
                               heads=heads, dim_head=dim_head)

    # --- VMEM budget computed from the actual buffers, capped for v7x (64 MiB). ---
    bf, f4 = 2, 4
    layer_block_bytes = ((D * 3 * inner + inner * D + D * mlp_dim + mlp_dim * D) * bf
                         + (6 * D + mlp_dim) * f4)               # per-layer weights + biases
    io_bytes = 3 * B * N * D * f4                                # x in, out, x_acc
    interm_bytes = (B * N * 3 * inner * bf                       # qkv (bf16)
                    + B * N * N * f4                             # one head's scores
                    + B * N * inner * f4                         # av accumulation
                    + B * N * mlp_dim * f4)                      # h1
    vmem_needed = 2 * layer_block_bytes + io_bytes + 2 * interm_bytes
    vmem_limit = int(min(48 * 1024 * 1024, max(32 * 1024 * 1024, vmem_needed)))

    # Advisory cost estimate (weights streamed once; no B x re-fetch).
    flops = depth * B * (2 * N * D * 3 * inner                   # fused QKV
                         + 4 * heads * N * N * dim_head          # scores + AV
                         + 2 * N * inner * D                     # output projection
                         + 4 * N * D * mlp_dim)                  # MLP
    transcendentals = depth * B * (heads * N * N + N * mlp_dim) + B * N
    weight_bytes = sum(int(prepped[k].size) * prepped[k].dtype.itemsize
                       for k in ("wqkv", "wout", "w1", "w2", "ln1g", "ln1b",
                                 "ln2g", "ln2b", "bout", "b1", "b2",
                                 "norm_g", "norm_b"))
    bytes_accessed = weight_bytes + 2 * B * N * D * 4

    out = pl.pallas_call(
        kernel,
        out_shape=jax.ShapeDtypeStruct((B, N, D), jnp.float32),
        grid_spec=pltpu.PrefetchScalarGridSpec(
            num_scalar_prefetch=0,
            grid=(depth,),                                       # layer axis only
            in_specs=in_specs,
            out_specs=pl.BlockSpec((B, N, D), lambda l: (0, 0, 0)),
            scratch_shapes=[pltpu.VMEM((B * N, D), jnp.float32)],  # x carried per layer
        ),
        compiler_params=pltpu.CompilerParams(
            dimension_semantics=("arbitrary",),                  # x_acc carry requires it
            vmem_limit_bytes=vmem_limit,
        ),
        cost_estimate=pl.CostEstimate(flops=flops,
                                      transcendentals=transcendentals,
                                      bytes_accessed=bytes_accessed),
    )(x, prepped["ln1g"], prepped["ln1b"], prepped["wqkv"], prepped["wout"],
      prepped["bout"], prepped["ln2g"], prepped["ln2b"], prepped["w1"],
      prepped["b1"], prepped["w2"], prepped["b2"],
      prepped["norm_g"], prepped["norm_b"])
    return out


# ---------------------------------------------------------------------------
# Pure-JAX fp32 reference (mirrors the PyTorch forward exactly)
# ---------------------------------------------------------------------------
def transformer_block_ref(x, params, *, depth, heads, dim_head):
    scale = dim_head ** (-0.5)
    inner = heads * dim_head
    B, N, D = x.shape

    def ln(x, g, b):
        mu = jnp.mean(x, axis=-1, keepdims=True)
        var = jnp.mean((x - mu) ** 2, axis=-1, keepdims=True)
        return (x - mu) / jnp.sqrt(var + 1e-5) * g + b

    for l in range(depth):
        h = ln(x, params["ln1g"][l], params["ln1b"][l])
        qkv = h @ params["wqkv"][l]
        q, k, v = jnp.split(qkv, 3, axis=-1)
        q = q.reshape(B, N, heads, dim_head).transpose(0, 2, 1, 3)
        k = k.reshape(B, N, heads, dim_head).transpose(0, 2, 1, 3)
        v = v.reshape(B, N, heads, dim_head).transpose(0, 2, 1, 3)
        dots = jnp.einsum("bhnd,bhmd->bhnm", q, k) * scale
        attn = jax.nn.softmax(dots, axis=-1)
        out = jnp.einsum("bhnm,bhmd->bhnd", attn, v)
        out = out.transpose(0, 2, 1, 3).reshape(B, N, inner)
        out = out @ params["wout"][l] + params["bout"][l]
        x = out + x

        h = ln(x, params["ln2g"][l], params["ln2b"][l])
        h = h @ params["w1"][l] + params["b1"][l]
        h = 0.5 * h * (1.0 + jax.lax.erf(h / jnp.sqrt(2.0)))
        h = h @ params["w2"][l] + params["b2"][l]
        x = h + x

    return ln(x, params["norm_g"][0], params["norm_b"][0])


# ---------------------------------------------------------------------------
# Deterministic parameter construction (synthetic, not a checkpoint)
# ---------------------------------------------------------------------------
def init_params(key, *, depth, dim, heads, dim_head, mlp_dim):
    inner = heads * dim_head
    ks = jax.random.split(key, 8)
    s = 0.05
    return {
        "ln1g": jnp.ones((depth, dim), jnp.float32),
        "ln1b": jnp.zeros((depth, dim), jnp.float32),
        "wqkv": s * jax.random.normal(ks[0], (depth, dim, 3 * inner), jnp.float32),
        "wout": s * jax.random.normal(ks[1], (depth, inner, dim), jnp.float32),
        "bout": s * jax.random.normal(ks[2], (depth, dim), jnp.float32),
        "ln2g": jnp.ones((depth, dim), jnp.float32),
        "ln2b": jnp.zeros((depth, dim), jnp.float32),
        "w1":   s * jax.random.normal(ks[3], (depth, dim, mlp_dim), jnp.float32),
        "b1":   s * jax.random.normal(ks[4], (depth, mlp_dim), jnp.float32),
        "w2":   s * jax.random.normal(ks[5], (depth, mlp_dim, dim), jnp.float32),
        "b2":   s * jax.random.normal(ks[6], (depth, dim), jnp.float32),
        "norm_g": jnp.ones((1, dim), jnp.float32),
        "norm_b": jnp.zeros((1, dim), jnp.float32),
    }


if __name__ == "__main__":
    # Small shapes consistent with the module's forward: x is (batch, seq, dim).
    B, N, dim = 2, 8, 32
    depth, heads, dim_head, mlp_dim = 2, 4, 16, 64

    key = jax.random.PRNGKey(0)
    kx, kp = jax.random.split(key)
    x = jax.random.normal(kx, (B, N, dim), jnp.float32)
    params = init_params(kp, depth=depth, dim=dim, heads=heads,
                         dim_head=dim_head, mlp_dim=mlp_dim)

    # One-time weight restructuring (outside the kernel wrapper).
    prepped = jax.tree_util.tree_map(
        jax.block_until_ready,
        prepare_params(params, depth=depth, heads=heads, dim_head=dim_head))

    out = transformer_block_pallas(x, prepped, depth=depth, heads=heads,
                                   dim_head=dim_head)
    out = jax.block_until_ready(out)

    ref = transformer_block_ref(x, params, depth=depth, heads=heads,
                                dim_head=dim_head)
    assert out.shape == (B, N, dim)
    # bf16 matmul operands (f32 accumulate) -> loosened tolerance vs f32 reference.
    err = float(jnp.max(jnp.abs(out - ref)))
    assert err < 3e-2, f"max abs err {err}"

    print("KERNEL_OK")
</pallas_src>

<mosaic_0001>
module attributes {stable_mosaic.version = 11 : i64} {
  func.func @_block_kernel(%arg0: i32, %arg1: memref<2x8x32xf32, #tpu.memory_space<vmem>>, %arg2: memref<1x1x32xf32, #tpu.memory_space<vmem>>, %arg3: memref<1x1x32xf32, #tpu.memory_space<vmem>>, %arg4: memref<1x32x192xbf16, #tpu.memory_space<vmem>>, %arg5: memref<1x64x32xbf16, #tpu.memory_space<vmem>>, %arg6: memref<1x1x32xf32, #tpu.memory_space<vmem>>, %arg7: memref<1x1x32xf32, #tpu.memory_space<vmem>>, %arg8: memref<1x1x32xf32, #tpu.memory_space<vmem>>, %arg9: memref<1x32x64xbf16, #tpu.memory_space<vmem>>, %arg10: memref<1x1x64xf32, #tpu.memory_space<vmem>>, %arg11: memref<1x64x32xbf16, #tpu.memory_space<vmem>>, %arg12: memref<1x1x32xf32, #tpu.memory_space<vmem>>, %arg13: memref<1x32xf32, #tpu.memory_space<vmem>>, %arg14: memref<1x32xf32, #tpu.memory_space<vmem>>, %arg15: memref<2x8x32xf32, #tpu.memory_space<vmem>>, %arg16: memref<16x32xf32, #tpu.memory_space<vmem>>) attributes {dimension_semantics = [#tpu.dimension_semantics<arbitrary>], iteration_bounds = array<i64: 2>, scalar_prefetch = 0 : i64, scratch_operands = 1 : i64, tpu.core_type = #tpu.core_type<tc>, window_params = [{pipeline_mode = #tpu.pipeline_mode<synchronous>, transform_indices = @transform_0, window_bounds = array<i64: 2, 8, 32>}, {transform_indices = @transform_1, window_bounds = array<i64: 1, 1, 32>}, {transform_indices = @transform_2, window_bounds = array<i64: 1, 1, 32>}, {transform_indices = @transform_3, window_bounds = array<i64: 1, 32, 192>}, {transform_indices = @transform_4, window_bounds = array<i64: 1, 64, 32>}, {transform_indices = @transform_5, window_bounds = array<i64: 1, 1, 32>}, {transform_indices = @transform_6, window_bounds = array<i64: 1, 1, 32>}, {transform_indices = @transform_7, window_bounds = array<i64: 1, 1, 32>}, {transform_indices = @transform_8, window_bounds = array<i64: 1, 32, 64>}, {transform_indices = @transform_9, window_bounds = array<i64: 1, 1, 64>}, {transform_indices = @transform_10, window_bounds = array<i64: 1, 64, 32>}, {transform_indices = @transform_11, window_bounds = array<i64: 1, 1, 32>}, {pipeline_mode = #tpu.pipeline_mode<synchronous>, transform_indices = @transform_12, window_bounds = array<i64: 1, 32>}, {pipeline_mode = #tpu.pipeline_mode<synchronous>, transform_indices = @transform_13, window_bounds = array<i64: 1, 32>}, {pipeline_mode = #tpu.pipeline_mode<synchronous>, transform_indices = @transform_14, window_bounds = array<i64: 2, 8, 32>}]} {
    %c0_i32 = arith.constant 0 : i32
    %0 = arith.cmpi eq, %arg0, %c0_i32 : i32
    %1 = arith.extui %0 : i1 to i32
    %c0_i32_0 = arith.constant 0 : i32
    %2 = arith.cmpi ne, %1, %c0_i32_0 : i32
    scf.if %2 {
      %c0_70 = arith.constant 0 : index
      %c0_71 = arith.constant 0 : index
      %c0_72 = arith.constant 0 : index
      %173 = vector.load %arg1[%c0_70, %c0_71, %c0_72] : memref<2x8x32xf32, #tpu.memory_space<vmem>>, vector<2x8x32xf32>
      %174 = vector.shape_cast %173 : vector<2x8x32xf32> to vector<16x32xf32>
      %c0_73 = arith.constant 0 : index
      %c0_74 = arith.constant 0 : index
      %175 = vector.load %arg16[%c0_73, %c0_74] : memref<16x32xf32, #tpu.memory_space<vmem>>, vector<16x32xf32>
      tpu.vector_store %arg16[%c0_73, %c0_74], %174 {strides = array<i32>} : memref<16x32xf32, #tpu.memory_space<vmem>>, vector<16x32xf32>,
    } else {
    }
    %c0 = arith.constant 0 : index
    %c0_1 = arith.constant 0 : index
    %3 = vector.load %arg16[%c0, %c0_1] : memref<16x32xf32, #tpu.memory_space<vmem>>, vector<16x32xf32>
    %c0_2 = arith.constant 0 : index
    %c0_3 = arith.constant 0 : index
    %c0_4 = arith.constant 0 : index
    %4 = vector.load %arg2[%c0_2, %c0_3, %c0_4] : memref<1x1x32xf32, #tpu.memory_space<vmem>>, vector<1x1x32xf32>
    %5 = vector.shape_cast %4 : vector<1x1x32xf32> to vector<1x32xf32>
    %c0_5 = arith.constant 0 : index
    %c0_6 = arith.constant 0 : index
    %c0_7 = arith.constant 0 : index
    %6 = vector.load %arg3[%c0_5, %c0_6, %c0_7] : memref<1x1x32xf32, #tpu.memory_space<vmem>>, vector<1x1x32xf32>
    %7 = vector.shape_cast %6 : vector<1x1x32xf32> to vector<1x32xf32>
    %cst = arith.constant dense<0.000000e+00> : vector<16xf32>
    %8 = vector.multi_reduction <add>, %3, %cst [1] : vector<16x32xf32> to vector<16xf32>
    %9 = vector.shape_cast %8 : vector<16xf32> to vector<16x1xf32>
    %cst_8 = arith.constant 3.200000e+01 : f32
    %10 = vector.broadcast %cst_8 : f32 to vector<16x1xf32>
    %11 = arith.divf %9, %10 : vector<16x1xf32>
    %12 = vector.broadcast %11 : vector<16x1xf32> to vector<16x32xf32>
    %13 = arith.subf %3, %12 : vector<16x32xf32>
    %14 = arith.mulf %13, %13 : vector<16x32xf32>
    %cst_9 = arith.constant dense<0.000000e+00> : vector<16xf32>
    %15 = vector.multi_reduction <add>, %14, %cst_9 [1] : vector<16x32xf32> to vector<16xf32>
    %16 = vector.shape_cast %15 : vector<16xf32> to vector<16x1xf32>
    %cst_10 = arith.constant 3.200000e+01 : f32
    %17 = vector.broadcast %cst_10 : f32 to vector<16x1xf32>
    %18 = arith.divf %16, %17 : vector<16x1xf32>
    %19 = vector.broadcast %11 : vector<16x1xf32> to vector<16x32xf32>
    %20 = arith.subf %3, %19 : vector<16x32xf32>
    %cst_11 = arith.constant 9.99999974E-6 : f32
    %21 = vector.broadcast %cst_11 : f32 to vector<16x1xf32>
    %22 = arith.addf %18, %21 : vector<16x1xf32>
    %23 = math.rsqrt %22 : vector<16x1xf32>
    %24 = vector.broadcast %23 : vector<16x1xf32> to vector<16x32xf32>
    %25 = arith.mulf %20, %24 : vector<16x32xf32>
    %26 = vector.broadcast %5 : vector<1x32xf32> to vector<16x32xf32>
    %27 = arith.mulf %25, %26 : vector<16x32xf32>
    %28 = vector.broadcast %7 : vector<1x32xf32> to vector<16x32xf32>
    %29 = arith.addf %27, %28 : vector<16x32xf32>
    %30 = arith.truncf %29 : vector<16x32xf32> to vector<16x32xbf16>
    %c0_12 = arith.constant 0 : index
    %c0_13 = arith.constant 0 : index
    %c0_14 = arith.constant 0 : index
    %31 = vector.load %arg4[%c0_12, %c0_13, %c0_14] : memref<1x32x192xbf16, #tpu.memory_space<vmem>>, vector<1x32x192xbf16>
    %32 = vector.shape_cast %31 : vector<1x32x192xbf16> to vector<32x192xbf16>
    %cst_15 = arith.constant dense<0.000000e+00> : vector<16x192xf32>
    %33 = tpu.matmul %30, %32, %cst_15 {dimension_numbers = #tpu.dot_dimension_numbers<[1], [0], [0], [1], [0, 0, 1, 1], [], []>} : vector<16x32xbf16>, vector<32x192xbf16>, vector<16x192xf32> -> vector<16x192xf32>
    %34 = arith.truncf %33 : vector<16x192xf32> to vector<16x192xbf16>
    %35 = vector.extract_strided_slice %34 {offsets = [0, 0], sizes = [16, 16], strides = [1, 1]} : vector<16x192xbf16> to vector<16x16xbf16>
    %36 = vector.shape_cast %35 : vector<16x16xbf16> to vector<2x8x16xbf16>
    %37 = vector.extract_strided_slice %34 {offsets = [0, 64], sizes = [16, 16], strides = [1, 1]} : vector<16x192xbf16> to vector<16x16xbf16>
    %38 = vector.shape_cast %37 : vector<16x16xbf16> to vector<2x8x16xbf16>
    %39 = vector.extract_strided_slice %34 {offsets = [0, 128], sizes = [16, 16], strides = [1, 1]} : vector<16x192xbf16> to vector<16x16xbf16>
    %40 = vector.shape_cast %39 : vector<16x16xbf16> to vector<2x8x16xbf16>
    %cst_16 = arith.constant dense<0.000000e+00> : vector<2x8x8xf32>
    %41 = tpu.matmul %36, %38, %cst_16 {dimension_numbers = #tpu.dot_dimension_numbers<[2], [2], [1], [1], [0, 0, 0, 1, 1, 1], [0], [0]>} : vector<2x8x16xbf16>, vector<2x8x16xbf16>, vector<2x8x8xf32> -> vector<2x8x8xf32>
    %cst_17 = arith.constant dense<0xFF800000> : vector<2x8xf32>
    %42 = vector.multi_reduction <maximumf>, %41, %cst_17 [2] : vector<2x8x8xf32> to vector<2x8xf32>
    %43 = vector.shape_cast %42 : vector<2x8xf32> to vector<2x8x1xf32>
    %44 = vector.broadcast %43 : vector<2x8x1xf32> to vector<2x8x8xf32>
    %45 = arith.subf %41, %44 : vector<2x8x8xf32>
    %46 = math.exp %45 : vector<2x8x8xf32>
    %cst_18 = arith.constant dense<0.000000e+00> : vector<2x8xf32>
    %47 = vector.multi_reduction <add>, %46, %cst_18 [2] : vector<2x8x8xf32> to vector<2x8xf32>
    %48 = vector.shape_cast %47 : vector<2x8xf32> to vector<2x8x1xf32>
    %49 = vector.broadcast %48 : vector<2x8x1xf32> to vector<2x8x8xf32>
    %50 = arith.divf %46, %49 : vector<2x8x8xf32>
    %51 = arith.truncf %50 : vector<2x8x8xf32> to vector<2x8x8xbf16>
    %cst_19 = arith.constant dense<0.000000e+00> : vector<2x8x16xf32>
    %52 = tpu.matmul %51, %40, %cst_19 {dimension_numbers = #tpu.dot_dimension_numbers<[2], [1], [1], [2], [0, 0, 0, 1, 1, 2], [0], [0]>} : vector<2x8x8xbf16>, vector<2x8x16xbf16>, vector<2x8x16xf32> -> vector<2x8x16xf32>
    %53 = vector.extract_strided_slice %34 {offsets = [0, 16], sizes = [16, 16], strides = [1, 1]} : vector<16x192xbf16> to vector<16x16xbf16>
    %54 = vector.shape_cast %53 : vector<16x16xbf16> to vector<2x8x16xbf16>
    %55 = vector.extract_strided_slice %34 {offsets = [0, 80], sizes = [16, 16], strides = [1, 1]} : vector<16x192xbf16> to vector<16x16xbf16>
    %56 = vector.shape_cast %55 : vector<16x16xbf16> to vector<2x8x16xbf16>
    %57 = vector.extract_strided_slice %34 {offsets = [0, 144], sizes = [16, 16], strides = [1, 1]} : vector<16x192xbf16> to vector<16x16xbf16>
    %58 = vector.shape_cast %57 : vector<16x16xbf16> to vector<2x8x16xbf16>
    %cst_20 = arith.constant dense<0.000000e+00> : vector<2x8x8xf32>
    %59 = tpu.matmul %54, %56, %cst_20 {dimension_numbers = #tpu.dot_dimension_numbers<[2], [2], [1], [1], [0, 0, 0, 1, 1, 1], [0], [0]>} : vector<2x8x16xbf16>, vector<2x8x16xbf16>, vector<2x8x8xf32> -> vector<2x8x8xf32>
    %cst_21 = arith.constant dense<0xFF800000> : vector<2x8xf32>
    %60 = vector.multi_reduction <maximumf>, %59, %cst_21 [2] : vector<2x8x8xf32> to vector<2x8xf32>
    %61 = vector.shape_cast %60 : vector<2x8xf32> to vector<2x8x1xf32>
    %62 = vector.broadcast %61 : vector<2x8x1xf32> to vector<2x8x8xf32>
    %63 = arith.subf %59, %62 : vector<2x8x8xf32>
    %64 = math.exp %63 : vector<2x8x8xf32>
    %cst_22 = arith.constant dense<0.000000e+00> : vector<2x8xf32>
    %65 = vector.multi_reduction <add>, %64, %cst_22 [2] : vector<2x8x8xf32> to vector<2x8xf32>
    %66 = vector.shape_cast %65 : vector<2x8xf32> to vector<2x8x1xf32>
    %67 = vector.broadcast %66 : vector<2x8x1xf32> to vector<2x8x8xf32>
    %68 = arith.divf %64, %67 : vector<2x8x8xf32>
    %69 = arith.truncf %68 : vector<2x8x8xf32> to vector<2x8x8xbf16>
    %cst_23 = arith.constant dense<0.000000e+00> : vector<2x8x16xf32>
    %70 = tpu.matmul %69, %58, %cst_23 {dimension_numbers = #tpu.dot_dimension_numbers<[2], [1], [1], [2], [0, 0, 0, 1, 1, 2], [0], [0]>} : vector<2x8x8xbf16>, vector<2x8x16xbf16>, vector<2x8x16xf32> -> vector<2x8x16xf32>
    %71 = vector.extract_strided_slice %34 {offsets = [0, 32], sizes = [16, 16], strides = [1, 1]} : vector<16x192xbf16> to vector<16x16xbf16>
    %72 = vector.shape_cast %71 : vector<16x16xbf16> to vector<2x8x16xbf16>
    %73 = vector.extract_strided_slice %34 {offsets = [0, 96], sizes = [16, 16], strides = [1, 1]} : vector<16x192xbf16> to vector<16x16xbf16>
    %74 = vector.shape_cast %73 : vector<16x16xbf16> to vector<2x8x16xbf16>
    %75 = vector.extract_strided_slice %34 {offsets = [0, 160], sizes = [16, 16], strides = [1, 1]} : vector<16x192xbf16> to vector<16x16xbf16>
    %76 = vector.shape_cast %75 : vector<16x16xbf16> to vector<2x8x16xbf16>
    %cst_24 = arith.constant dense<0.000000e+00> : vector<2x8x8xf32>
    %77 = tpu.matmul %72, %74, %cst_24 {dimension_numbers = #tpu.dot_dimension_numbers<[2], [2], [1], [1], [0, 0, 0, 1, 1, 1], [0], [0]>} : vector<2x8x16xbf16>, vector<2x8x16xbf16>, vector<2x8x8xf32> -> vector<2x8x8xf32>
    %cst_25 = arith.constant dense<0xFF800000> : vector<2x8xf32>
    %78 = vector.multi_reduction <maximumf>, %77, %cst_25 [2] : vector<2x8x8xf32> to vector<2x8xf32>
    %79 = vector.shape_cast %78 : vector<2x8xf32> to vector<2x8x1xf32>
    %80 = vector.broadcast %79 : vector<2x8x1xf32> to vector<2x8x8xf32>
    %81 = arith.subf %77, %80 : vector<2x8x8xf32>
    %82 = math.exp %81 : vector<2x8x8xf32>
    %cst_26 = arith.constant dense<0.000000e+00> : vector<2x8xf32>
    %83 = vector.multi_reduction <add>, %82, %cst_26 [2] : vector<2x8x8xf32> to vector<2x8xf32>
    %84 = vector.shape_cast %83 : vector<2x8xf32> to vector<2x8x1xf32>
    %85 = vector.broadcast %84 : vector<2x8x1xf32> to vector<2x8x8xf32>
    %86 = arith.divf %82, %85 : vector<2x8x8xf32>
    %87 = arith.truncf %86 : vector<2x8x8xf32> to vector<2x8x8xbf16>
    %cst_27 = arith.constant dense<0.000000e+00> : vector<2x8x16xf32>
    %88 = tpu.matmul %87, %76, %cst_27 {dimension_numbers = #tpu.dot_dimension_numbers<[2], [1], [1], [2], [0, 0, 0, 1, 1, 2], [0], [0]>} : vector<2x8x8xbf16>, vector<2x8x16xbf16>, vector<2x8x16xf32> -> vector<2x8x16xf32>
    %89 = vector.extract_strided_slice %34 {offsets = [0, 48], sizes = [16, 16], strides = [1, 1]} : vector<16x192xbf16> to vector<16x16xbf16>
    %90 = vector.shape_cast %89 : vector<16x16xbf16> to vector<2x8x16xbf16>
    %91 = vector.extract_strided_slice %34 {offsets = [0, 112], sizes = [16, 16], strides = [1, 1]} : vector<16x192xbf16> to vector<16x16xbf16>
    %92 = vector.shape_cast %91 : vector<16x16xbf16> to vector<2x8x16xbf16>
    %93 = vector.extract_strided_slice %34 {offsets = [0, 176], sizes = [16, 16], strides = [1, 1]} : vector<16x192xbf16> to vector<16x16xbf16>
    %94 = vector.shape_cast %93 : vector<16x16xbf16> to vector<2x8x16xbf16>
    %cst_28 = arith.constant dense<0.000000e+00> : vector<2x8x8xf32>
    %95 = tpu.matmul %90, %92, %cst_28 {dimension_numbers = #tpu.dot_dimension_numbers<[2], [2], [1], [1], [0, 0, 0, 1, 1, 1], [0], [0]>} : vector<2x8x16xbf16>, vector<2x8x16xbf16>, vector<2x8x8xf32> -> vector<2x8x8xf32>
    %cst_29 = arith.constant dense<0xFF800000> : vector<2x8xf32>
    %96 = vector.multi_reduction <maximumf>, %95, %cst_29 [2] : vector<2x8x8xf32> to vector<2x8xf32>
    %97 = vector.shape_cast %96 : vector<2x8xf32> to vector<2x8x1xf32>
    %98 = vector.broadcast %97 : vector<2x8x1xf32> to vector<2x8x8xf32>
    %99 = arith.subf %95, %98 : vector<2x8x8xf32>
    %100 = math.exp %99 : vector<2x8x8xf32>
    %cst_30 = arith.constant dense<0.000000e+00> : vector<2x8xf32>
    %101 = vector.multi_reduction <add>, %100, %cst_30 [2] : vector<2x8x8xf32> to vector<2x8xf32>
    %102 = vector.shape_cast %101 : vector<2x8xf32> to vector<2x8x1xf32>
    %103 = vector.broadcast %102 : vector<2x8x1xf32> to vector<2x8x8xf32>
    %104 = arith.divf %100, %103 : vector<2x8x8xf32>
    %105 = arith.truncf %104 : vector<2x8x8xf32> to vector<2x8x8xbf16>
    %cst_31 = arith.constant dense<0.000000e+00> : vector<2x8x16xf32>
    %106 = tpu.matmul %105, %94, %cst_31 {dimension_numbers = #tpu.dot_dimension_numbers<[2], [1], [1], [2], [0, 0, 0, 1, 1, 2], [0], [0]>} : vector<2x8x8xbf16>, vector<2x8x16xbf16>, vector<2x8x16xf32> -> vector<2x8x16xf32>
    %107 = tpu.concatenate %52, %70, %88, %106 in 2 : vector<2x8x16xf32>, vector<2x8x16xf32>, vector<2x8x16xf32>, vector<2x8x16xf32> -> vector<2x8x64xf32>
    %108 = vector.shape_cast %107 : vector<2x8x64xf32> to vector<16x64xf32>
    %109 = arith.truncf %108 : vector<16x64xf32> to vector<16x64xbf16>
    %c0_32 = arith.constant 0 : index
    %c0_33 = arith.constant 0 : index
    %c0_34 = arith.constant 0 : index
    %110 = vector.load %arg5[%c0_32, %c0_33, %c0_34] : memref<1x64x32xbf16, #tpu.memory_space<vmem>>, vector<1x64x32xbf16>
    %111 = vector.shape_cast %110 : vector<1x64x32xbf16> to vector<64x32xbf16>
    %cst_35 = arith.constant dense<0.000000e+00> : vector<16x32xf32>
    %112 = tpu.matmul %109, %111, %cst_35 {dimension_numbers = #tpu.dot_dimension_numbers<[1], [0], [0], [1], [0, 0, 1, 1], [], []>} : vector<16x64xbf16>, vector<64x32xbf16>, vector<16x32xf32> -> vector<16x32xf32>
    %c0_36 = arith.constant 0 : index
    %c0_37 = arith.constant 0 : index
    %c0_38 = arith.constant 0 : index
    %113 = vector.load %arg6[%c0_36, %c0_37, %c0_38] : memref<1x1x32xf32, #tpu.memory_space<vmem>>, vector<1x1x32xf32>
    %114 = vector.shape_cast %113 : vector<1x1x32xf32> to vector<1x32xf32>
    %115 = vector.broadcast %114 : vector<1x32xf32> to vector<16x32xf32>
    %116 = arith.addf %112, %115 : vector<16x32xf32>
    %117 = arith.addf %116, %3 : vector<16x32xf32>
    %c0_39 = arith.constant 0 : index
    %c0_40 = arith.constant 0 : index
    %c0_41 = arith.constant 0 : index
    %118 = vector.load %arg7[%c0_39, %c0_40, %c0_41] : memref<1x1x32xf32, #tpu.memory_space<vmem>>, vector<1x1x32xf32>
    %119 = vector.shape_cast %118 : vector<1x1x32xf32> to vector<1x32xf32>
    %c0_42 = arith.constant 0 : index
    %c0_43 = arith.constant 0 : index
    %c0_44 = arith.constant 0 : index
    %120 = vector.load %arg8[%c0_42, %c0_43, %c0_44] : memref<1x1x32xf32, #tpu.memory_space<vmem>>, vector<1x1x32xf32>
    %121 = vector.shape_cast %120 : vector<1x1x32xf32> to vector<1x32xf32>
    %cst_45 = arith.constant dense<0.000000e+00> : vector<16xf32>
    %122 = vector.multi_reduction <add>, %117, %cst_45 [1] : vector<16x32xf32> to vector<16xf32>
    %123 = vector.shape_cast %122 : vector<16xf32> to vector<16x1xf32>
    %cst_46 = arith.constant 3.200000e+01 : f32
    %124 = vector.broadcast %cst_46 : f32 to vector<16x1xf32>
    %125 = arith.divf %123, %124 : vector<16x1xf32>
    %126 = vector.broadcast %125 : vector<16x1xf32> to vector<16x32xf32>
    %127 = arith.subf %117, %126 : vector<16x32xf32>
    %128 = arith.mulf %127, %127 : vector<16x32xf32>
    %cst_47 = arith.constant dense<0.000000e+00> : vector<16xf32>
    %129 = vector.multi_reduction <add>, %128, %cst_47 [1] : vector<16x32xf32> to vector<16xf32>
    %130 = vector.shape_cast %129 : vector<16xf32> to vector<16x1xf32>
    %cst_48 = arith.constant 3.200000e+01 : f32
    %131 = vector.broadcast %cst_48 : f32 to vector<16x1xf32>
    %132 = arith.divf %130, %131 : vector<16x1xf32>
    %133 = vector.broadcast %125 : vector<16x1xf32> to vector<16x32xf32>
    %134 = arith.subf %117, %133 : vector<16x32xf32>
    %cst_49 = arith.constant 9.99999974E-6 : f32
    %135 = vector.broadcast %cst_49 : f32 to vector<16x1xf32>
    %136 = arith.addf %132, %135 : vector<16x1xf32>
    %137 = math.rsqrt %136 : vector<16x1xf32>
    %138 = vector.broadcast %137 : vector<16x1xf32> to vector<16x32xf32>
    %139 = arith.mulf %134, %138 : vector<16x32xf32>
    %140 = vector.broadcast %119 : vector<1x32xf32> to vector<16x32xf32>
    %141 = arith.mulf %139, %140 : vector<16x32xf32>
    %142 = vector.broadcast %121 : vector<1x32xf32> to vector<16x32xf32>
    %143 = arith.addf %141, %142 : vector<16x32xf32>
    %144 = arith.truncf %143 : vector<16x32xf32> to vector<16x32xbf16>
    %c0_50 = arith.constant 0 : index
    %c0_51 = arith.constant 0 : index
    %c0_52 = arith.constant 0 : index
    %145 = vector.load %arg9[%c0_50, %c0_51, %c0_52] : memref<1x32x64xbf16, #tpu.memory_space<vmem>>, vector<1x32x64xbf16>
    %146 = vector.shape_cast %145 : vector<1x32x64xbf16> to vector<32x64xbf16>
    %cst_53 = arith.constant dense<0.000000e+00> : vector<16x64xf32>
    %147 = tpu.matmul %144, %146, %cst_53 {dimension_numbers = #tpu.dot_dimension_numbers<[1], [0], [0], [1], [0, 0, 1, 1], [], []>} : vector<16x32xbf16>, vector<32x64xbf16>, vector<16x64xf32> -> vector<16x64xf32>
    %c0_54 = arith.constant 0 : index
    %c0_55 = arith.constant 0 : index
    %c0_56 = arith.constant 0 : index
    %148 = vector.load %arg10[%c0_54, %c0_55, %c0_56] : memref<1x1x64xf32, #tpu.memory_space<vmem>>, vector<1x1x64xf32>
    %149 = vector.shape_cast %148 : vector<1x1x64xf32> to vector<1x64xf32>
    %150 = vector.broadcast %149 : vector<1x64xf32> to vector<16x64xf32>
    %151 = arith.addf %147, %150 : vector<16x64xf32>
    %cst_57 = arith.constant 5.000000e-01 : f32
    %152 = vector.broadcast %cst_57 : f32 to vector<16x64xf32>
    %153 = arith.mulf %152, %151 : vector<16x64xf32>
    %cst_58 = arith.constant 0.707106769 : f32
    %154 = vector.broadcast %cst_58 : f32 to vector<16x64xf32>
    %155 = arith.mulf %151, %154 : vector<16x64xf32>
    %156 = math.erf %155 : vector<16x64xf32>
    %cst_59 = arith.constant 1.000000e+00 : f32
    %157 = vector.broadcast %cst_59 : f32 to vector<16x64xf32>
    %158 = arith.addf %157, %156 : vector<16x64xf32>
    %159 = arith.mulf %153, %158 : vector<16x64xf32>
    %160 = arith.truncf %159 : vector<16x64xf32> to vector<16x64xbf16>
    %c0_60 = arith.constant 0 : index
    %c0_61 = arith.constant 0 : index
    %c0_62 = arith.constant 0 : index
    %161 = vector.load %arg11[%c0_60, %c0_61, %c0_62] : memref<1x64x32xbf16, #tpu.memory_space<vmem>>, vector<1x64x32xbf16>
    %162 = vector.shape_cast %161 : vector<1x64x32xbf16> to vector<64x32xbf16>
    %cst_63 = arith.constant dense<0.000000e+00> : vector<16x32xf32>
    %163 = tpu.matmul %160, %162, %cst_63 {dimension_numbers = #tpu.dot_dimension_numbers<[1], [0], [0], [1], [0, 0, 1, 1], [], []>} : vector<16x64xbf16>, vector<64x32xbf16>, vector<16x32xf32> -> vector<16x32xf32>
    %c0_64 = arith.constant 0 : index
    %c0_65 = arith.constant 0 : index
    %c0_66 = arith.constant 0 : index
    %164 = vector.load %arg12[%c0_64, %c0_65, %c0_66] : memref<1x1x32xf32, #tpu.memory_space<vmem>>, vector<1x1x32xf32>
    %165 = vector.shape_cast %164 : vector<1x1x32xf32> to vector<1x32xf32>
    %166 = vector.broadcast %165 : vector<1x32xf32> to vector<16x32xf32>
    %167 = arith.addf %163, %166 : vector<16x32xf32>
    %168 = arith.addf %167, %117 : vector<16x32xf32>
    %c0_67 = arith.constant 0 : index
    %c0_68 = arith.constant 0 : index
    %169 = vector.load %arg16[%c0_67, %c0_68] : memref<16x32xf32, #tpu.memory_space<vmem>>, vector<16x32xf32>
    tpu.vector_store %arg16[%c0_67, %c0_68], %168 {strides = array<i32>} : memref<16x32xf32, #tpu.memory_space<vmem>>, vector<16x32xf32>,
    %c1_i32 = arith.constant 1 : i32
    %170 = arith.cmpi eq, %arg0, %c1_i32 : i32
    %171 = arith.extui %170 : i1 to i32
    %c0_i32_69 = arith.constant 0 : i32
    %172 = arith.cmpi ne, %171, %c0_i32_69 : i32
    scf.if %172 {
      %c0_70 = arith.constant 0 : index
      %c0_71 = arith.constant 0 : index
      %173 = vector.load %arg13[%c0_70, %c0_71] : memref<1x32xf32, #tpu.memory_space<vmem>>, vector<1x32xf32>
      %174 = vector.shape_cast %173 : vector<1x32xf32> to vector<32xf32>
      %c0_72 = arith.constant 0 : index
      %c0_73 = arith.constant 0 : index
      %175 = vector.load %arg14[%c0_72, %c0_73] : memref<1x32xf32, #tpu.memory_space<vmem>>, vector<1x32xf32>
      %176 = vector.shape_cast %175 : vector<1x32xf32> to vector<32xf32>
      %cst_74 = arith.constant dense<0.000000e+00> : vector<16xf32>
      %177 = vector.multi_reduction <add>, %168, %cst_74 [1] : vector<16x32xf32> to vector<16xf32>
      %178 = vector.shape_cast %177 : vector<16xf32> to vector<16x1xf32>
      %cst_75 = arith.constant 3.200000e+01 : f32
      %179 = vector.broadcast %cst_75 : f32 to vector<16x1xf32>
      %180 = arith.divf %178, %179 : vector<16x1xf32>
      %181 = vector.broadcast %180 : vector<16x1xf32> to vector<16x32xf32>
      %182 = arith.subf %168, %181 : vector<16x32xf32>
      %183 = arith.mulf %182, %182 : vector<16x32xf32>
      %cst_76 = arith.constant dense<0.000000e+00> : vector<16xf32>
      %184 = vector.multi_reduction <add>, %183, %cst_76 [1] : vector<16x32xf32> to vector<16xf32>
      %185 = vector.shape_cast %184 : vector<16xf32> to vector<16x1xf32>
      %cst_77 = arith.constant 3.200000e+01 : f32
      %186 = vector.broadcast %cst_77 : f32 to vector<16x1xf32>
      %187 = arith.divf %185, %186 : vector<16x1xf32>
      %188 = vector.broadcast %180 : vector<16x1xf32> to vector<16x32xf32>
      %189 = arith.subf %168, %188 : vector<16x32xf32>
      %cst_78 = arith.constant 9.99999974E-6 : f32
      %190 = vector.broadcast %cst_78 : f32 to vector<16x1xf32>
      %191 = arith.addf %187, %190 : vector<16x1xf32>
      %192 = math.rsqrt %191 : vector<16x1xf32>
      %193 = vector.broadcast %192 : vector<16x1xf32> to vector<16x32xf32>
      %194 = arith.mulf %189, %193 : vector<16x32xf32>
      %195 = vector.shape_cast %174 : vector<32xf32> to vector<1x32xf32>
      %196 = vector.broadcast %195 : vector<1x32xf32> to vector<16x32xf32>
      %197 = arith.mulf %194, %196 : vector<16x32xf32>
      %198 = vector.shape_cast %176 : vector<32xf32> to vector<1x32xf32>
      %199 = vector.broadcast %198 : vector<1x32xf32> to vector<16x32xf32>
      %200 = arith.addf %197, %199 : vector<16x32xf32>
      %201 = vector.shape_cast %200 : vector<16x32xf32> to vector<2x8x32xf32>
      %c0_79 = arith.constant 0 : index
      %c0_80 = arith.constant 0 : index
      %c0_81 = arith.constant 0 : index
      %202 = vector.load %arg15[%c0_79, %c0_80, %c0_81] : memref<2x8x32xf32, #tpu.memory_space<vmem>>, vector<2x8x32xf32>
      tpu.vector_store %arg15[%c0_79, %c0_80, %c0_81], %201 {strides = array<i32>} : memref<2x8x32xf32, #tpu.memory_space<vmem>>, vector<2x8x32xf32>,
    } else {
    }
    return
  }
  func.func @transform_0(%arg0: i32) -> (i32, i32, i32) {
    %c0_i32 = arith.constant 0 : i32
    %c0_i32_0 = arith.constant 0 : i32
    %c0_i32_1 = arith.constant 0 : i32
    %c0_i32_2 = arith.constant 0 : i32
    return %c0_i32, %c0_i32_0, %c0_i32_1 : i32, i32, i32
  }
  func.func @transform_1(%arg0: i32) -> (i32, i32, i32) {
    %c0_i32 = arith.constant 0 : i32
    %c0_i32_0 = arith.constant 0 : i32
    %c0_i32_1 = arith.constant 0 : i32
    return %arg0, %c0_i32, %c0_i32_0 : i32, i32, i32
  }
  func.func @transform_2(%arg0: i32) -> (i32, i32, i32) {
    %c0_i32 = arith.constant 0 : i32
    %c0_i32_0 = arith.constant 0 : i32
    %c0_i32_1 = arith.constant 0 : i32
    return %arg0, %c0_i32, %c0_i32_0 : i32, i32, i32
  }
  func.func @transform_3(%arg0: i32) -> (i32, i32, i32) {
    %c0_i32 = arith.constant 0 : i32
    %c0_i32_0 = arith.constant 0 : i32
    %c0_i32_1 = arith.constant 0 : i32
    return %arg0, %c0_i32, %c0_i32_0 : i32, i32, i32
  }
  func.func @transform_4(%arg0: i32) -> (i32, i32, i32) {
    %c0_i32 = arith.constant 0 : i32
    %c0_i32_0 = arith.constant 0 : i32
    %c0_i32_1 = arith.constant 0 : i32
    return %arg0, %c0_i32, %c0_i32_0 : i32, i32, i32
  }
  func.func @transform_5(%arg0: i32) -> (i32, i32, i32) {
    %c0_i32 = arith.constant 0 : i32
    %c0_i32_0 = arith.constant 0 : i32
    %c0_i32_1 = arith.constant 0 : i32
    return %arg0, %c0_i32, %c0_i32_0 : i32, i32, i32
  }
  func.func @transform_6(%arg0: i32) -> (i32, i32, i32) {
    %c0_i32 = arith.constant 0 : i32
    %c0_i32_0 = arith.constant 0 : i32
    %c0_i32_1 = arith.constant 0 : i32
    return %arg0, %c0_i32, %c0_i32_0 : i32, i32, i32
  }
  func.func @transform_7(%arg0: i32) -> (i32, i32, i32) {
    %c0_i32 = arith.constant 0 : i32
    %c0_i32_0 = arith.constant 0 : i32
    %c0_i32_1 = arith.constant 0 : i32
    return %arg0, %c0_i32, %c0_i32_0 : i32, i32, i32
  }
  func.func @transform_8(%arg0: i32) -> (i32, i32, i32) {
    %c0_i32 = arith.constant 0 : i32
    %c0_i32_0 = arith.constant 0 : i32
    %c0_i32_1 = arith.constant 0 : i32
    return %arg0, %c0_i32, %c0_i32_0 : i32, i32, i32
  }
  func.func @transform_9(%arg0: i32) -> (i32, i32, i32) {
    %c0_i32 = arith.constant 0 : i32
    %c0_i32_0 = arith.constant 0 : i32
    %c0_i32_1 = arith.constant 0 : i32
    return %arg0, %c0_i32, %c0_i32_0 : i32, i32, i32
  }
  func.func @transform_10(%arg0: i32) -> (i32, i32, i32) {
    %c0_i32 = arith.constant 0 : i32
    %c0_i32_0 = arith.constant 0 : i32
    %c0_i32_1 = arith.constant 0 : i32
    return %arg0, %c0_i32, %c0_i32_0 : i32, i32, i32
  }
  func.func @transform_11(%arg0: i32) -> (i32, i32, i32) {
    %c0_i32 = arith.constant 0 : i32
    %c0_i32_0 = arith.constant 0 : i32
    %c0_i32_1 = arith.constant 0 : i32
    return %arg0, %c0_i32, %c0_i32_0 : i32, i32, i32
  }
  func.func @transform_12(%arg0: i32) -> (i32, i32) {
    %c0_i32 = arith.constant 0 : i32
    %c0_i32_0 = arith.constant 0 : i32
    %c0_i32_1 = arith.constant 0 : i32
    return %c0_i32, %c0_i32_0 : i32, i32
  }
  func.func @transform_13(%arg0: i32) -> (i32, i32) {
    %c0_i32 = arith.constant 0 : i32
    %c0_i32_0 = arith.constant 0 : i32
    %c0_i32_1 = arith.constant 0 : i32
    return %c0_i32, %c0_i32_0 : i32, i32
  }
  func.func @transform_14(%arg0: i32) -> (i32, i32, i32) {
    %c0_i32 = arith.constant 0 : i32
    %c0_i32_0 = arith.constant 0 : i32
    %c0_i32_1 = arith.constant 0 : i32
    %c0_i32_2 = arith.constant 0 : i32
    return %c0_i32, %c0_i32_0, %c0_i32_1 : i32, i32, i32
  }
}

</mosaic_0001>

<bundles_post_ra>
// kernel: tpu_custom_call.1
= control target key start
LH: loop header
LB: loop body
LE: loop exit
PB: predicated region body
PF: predicated region fallthrough
CT: control target
= control target key end

     0   :  { %s2529_s0 = inlined_call_operand.vmem [shape: f32[2,8,32], index: 0, kind: input, shape index: {}]   ;;  %s2530_s1 = inlined_call_operand.vmem [shape: f32[2,1,32], index: 1, kind: input, shape index: {}]   ;;  %s2531_s2 = inlined_call_operand.vmem [shape: f32[2,1,32], index: 2, kind: input, shape index: {}]   ;;  %s2532_s3 = inlined_call_operand.vmem [shape: bf16[2,32,192], index: 3, kind: input, shape index: {}]   ;;  %s2533_s4 = inlined_call_operand.vmem [shape: bf16[2,64,32], index: 4, kind: input, shape index: {}]   ;;  %s2534_s5 = inlined_call_operand.vmem [shape: f32[2,1,32], index: 5, kind: input, shape index: {}]   ;;  %s2535_s6 = inlined_call_operand.vmem [shape: f32[2,1,32], index: 6, kind: input, shape index: {}]   ;;  %s2536_s7 = inlined_call_operand.vmem [shape: f32[2,1,32], index: 7, kind: input, shape index: {}]   ;;  %s2537_s8 = inlined_call_operand.vmem [shape: bf16[2,32,64], index: 8, kind: input, shape index: {}]   ;;  %s2538_s9 = inlined_call_operand.vmem [shape: f32[2,1,64], index: 9, kind: input, shape index: {}]   ;;  %s2539_s10 = inlined_call_operand.vmem [shape: bf16[2,64,32], index: 10, kind: input, shape index: {}]   ;;  %s2540_s11 = inlined_call_operand.vmem [shape: f32[2,1,32], index: 11, kind: input, shape index: {}]   ;;  %s2541_s12 = inlined_call_operand.vmem [shape: f32[1,32], index: 12, kind: input, shape index: {}]   ;;  %s2542_s13 = inlined_call_operand.vmem [shape: f32[1,32], index: 13, kind: input, shape index: {}]   ;;  %s2543_s14 = inlined_call_operand.hbm [shape: f32[2,8,32], index: 14, kind: output, shape index: {}]  }
   0x1   :  { %2545 = sst [smem:[#allocation7_spill]] %s2532_s3 }
   0x2   :  { %2546 = sst [smem:[#allocation8_spill]] %s2533_s4 }
   0x3   :  { %2547 = sst [smem:[#allocation9_spill]] %s2541_s12 }
   0x4   :  { %2548 = sst [smem:[#allocation10_spill]] %s2542_s13 }
   0x5   :  { %2549 = sst [smem:[#allocation11_spill]] %s2543_s14 }
   0x6   :  { %19 = vsyncpa [#allocation4], 0  ;;  %s2186_s29 = smov 0  }
   0x7 LB: > { %2550 = sst [smem:[#allocation6_spill]] %s2098_s29  ;;  %s2192_s30 = sadd.s32 4294967295, %s2098_s29   ;;  %s2098_s29 = sphi %s2186_s29, %s25_s29  }
   0x8   : > { %p1849_p0 = scmp.ge.s32.totalorder %s2098_s29, 1  ;;  %p494_p1 = scmp.lt.s32.totalorder %s2098_s29, 3 }
   0xa   : > { %p495_p2 = pnand %p1849_p0, %p494_p1 }
   0xb   : > { %p571_p3 = scmp.lt.s32.totalorder (!%p495_p2), %s2192_s30, 1  ;;  %s2551_s3 = sld [smem:[#allocation7_spill]] (!%p495_p2) }
   0xc   : > { %498 = sbr.rel (%p495_p2) target bundleno = 2326 (0x916), region = 76  ;;  %s2552_s4 = sld [smem:[#allocation8_spill]] (!%p495_p2) }
   0xd   : > { %p1858_p4 = scmp.ne.s32.totalorder (!%p495_p2), %s2192_s30, 0 }
  0x11   : > { %s2198_s15 = scalar_select %p571_p3, %s2192_s30, 1 }
  0x13   : > { %s1943_s22 = sshll.u32 %s2198_s15, 5  ;;  %s592_s19 = scalar_lea.vmem %s2535_s6, %s2198_s15 }
  0x14   : > { %s2216_s28 = scalar_lea.vmem %s2551_s3, %s1943_s22  ;;  %s2221_s29 = scalar_lea.vmem %s2552_s4, %s1943_s22 }
  0x15   : > { %s595_s13 = scalar_lea.vmem %s2536_s7, %s2198_s15  ;;  %s1945_s23 = sshll.u32 %s2198_s15, 4 }
  0x16   : > { %s603_s26 = scalar_lea.vmem %s2538_s9, %s2198_s15  ;;  %s2239_s12 = scalar_lea.vmem %s2537_s8, %s1945_s23 }
  0x17   : > { %s2244_s4 = scalar_lea.vmem %s2539_s10, %s1943_s22  ;;  %s611_s21 = scalar_lea.vmem %s2540_s11, %s2198_s15 }
  0x18   : > { %616 = sbr.rel (%p1858_p4) target bundleno = 32 (0x20), region = 80 }
  0x1d   : > { %v617_v0 = vld [vmem:[%s2529_s0] sm:$0xff]  ;;  %vm619_vm0 = vcmask 261120   ;;  %v618_v1 = vld [vmem:[%s2529_s0 + $0x8] sm:$0xff] }
  0x1e   : > { %620 = vst.msk [vmem:[#allocation2] sm:$0xff] %vm619_vm0, %v617_v0 }
  0x1f   : > { %621 = vst.msk [vmem:[#allocation2 + $0x8] sm:$0xff] %vm619_vm0, %v618_v1 }
  0x20 PF: > { %vm626_vm1 = vcmask 261120   ;;  %v2100_v6 = vmov 32.0   ;;  %v1869_v23 = vld [vmem:[%s2216_s28 + $0x10] sm:$0xf]  ;;  %v1950_v24 = vld [vmem:[%s2216_s28 + $0x14] sm:$0xf0]  ;;  %s2553_s24 = scalar_lea.vmem %s2530_s1, %s2198_s15  ;;  %s2554_s17 = scalar_lea.vmem %s2531_s2, %s2198_s15 }
  0x21   : > { %2008 = vrcp.f32 %v2100_v6  ;;  %v1949_v25 = vld [vmem:[%s2216_s28 + $0x14] sm:$0xf]  ;;  %v1870_v26 = vor.u32 %v1950_v24, %v1869_v23  ;;  %v1871_v27 = vld [vmem:[%s2216_s28 + $0x18] sm:$0xf0]  ;;  %v1861_v29 = vld [vmem:[%s2216_s28] sm:$0xf] }
  0x22   : > { %v1874_v28 = vor.u32 %v1949_v25, %v1871_v27  ;;  %v1948_v30 = vld [vmem:[%s2216_s28 + $0x4] sm:$0xf0]  ;;  %v1947_v31 = vld [vmem:[%s2216_s28 + $0x4] sm:$0xf]  ;;  %v1863_v34 = vld [vmem:[%s2216_s28 + $0x8] sm:$0xf0] }
  0x23   : > { %722 = vmatpush.bf16.msra.mxu0 %v1870_v26  ;;  %v1862_v33 = vor.u32 %v1948_v30, %v1861_v29  ;;  %v1866_v36 = vor.u32 %v1947_v31, %v1863_v34  ;;  %v2001_v54 = vld [vmem:[%s2553_s24] ss:$0 sm:$0xff]  ;;  %vm851_vm9 = vcmask 1043456   ;;  %s2101_s14 = smov 48   ;;  %s2102_s18 = smov 64   ;;  %vm754_vm10 = vcmask 130048  }
  0x24   : > { %736 = vmatpush.bf16.msra.mxu1 %v1874_v28  ;;  %v2002_v59 = vld [vmem:[%s2554_s17] ss:$0 sm:$0xff]  ;;  %s2103_s20 = smov 32   ;;  %s2104_s25 = smov 16   ;;  %vm797_vm11 = vcmask 64512  }
  0x25   : > { %v2257_v2 = vld [vmem:[#allocation2] sm:$0xff]  ;;  %s2105_s3 = smov 96   ;;  %s2106_s23 = smov 112  }
  0x26   : > { %v627_v3 = vsel %vm626_vm1, %v2257_v2, 0.0  ;;  %v2261_v4 = vld [vmem:[#allocation2 + $0x8] sm:$0xff]  ;;  %s2107_s22 = smov 80   ;;  %s2555_s24 = scalar_lea.vmem %s2534_s5, %s2198_s15 }
  0x27   : > { %628 = vadd.xlane.f32.xlu0 %v627_v3  ;;  %v630_v5 = vsel %vm626_vm1, %v2261_v4, 0.0  ;;  %v2009_v7 = vpop.eup %2008  ;;  %723 = vmatpush.bf16.msra.mxu0 %v1862_v33  ;;  %p1938_p5 = scmp.ne.s32.totalorder %s2192_s30, 1 }
  0x28   : > { %v634_v8 = vmul.f32 32.0, %v2009_v7  ;;  %vm638_vm2 = vweird.f32 %v2009_v7  ;;  %737 = vmatpush.bf16.msra.mxu1 %v1866_v36 }
  0x2a   : > { %v635_v9 = vsub.f32 1.0, %v634_v8 }
  0x2c   : > { %v636_v10 = vmul.f32 %v2009_v7, %v635_v9 }
  0x2e   : > { %v637_v11 = vadd.f32 %v2009_v7, %v636_v10 }
  0x2f   : > { %631 = vadd.xlane.f32.xlu0 %v630_v5 }
  0x30   : > { %v2265_v12 = vsel %vm638_vm2, %v2009_v7, %v637_v11 }
  0x9a   : > { %v629_v13 = vpop.xlane.xlu0 %628 }
  0x9b   : > { %v640_v14 = vmul.f32 %v2265_v12, %v629_v13 }
  0x9d   : > { %v642_v15 = vsub.f32 %v2257_v2, %v640_v14 }
  0x9f   : > { %v644_v16 = vmul.f32 %v642_v15, %v642_v15 }
  0xa1   : > { %v646_v17 = vsel %vm626_vm1, %v644_v16, 0.0 }
  0xa2   : > { %647 = vadd.xlane.f32.xlu1 %v646_v17  ;;  %v632_v18 = vpop.xlane.xlu0 %631 }
  0xa3   : > { %v641_v19 = vmul.f32 %v2265_v12, %v632_v18 }
  0xa5   : > { %v643_v20 = vsub.f32 %v2261_v4, %v641_v19 }
  0xa7   : > { %v645_v21 = vmul.f32 %v643_v20, %v643_v20 }
  0xa9   : > { %v649_v22 = vsel %vm626_vm1, %v645_v21, 0.0 }
  0xaa   : > { %650 = vadd.xlane.f32.xlu1 %v649_v22 }
 0x115   : > { %v648_v32 = vpop.xlane.xlu1 %647 }
 0x116   : > { %v652_v35 = vmul.f32 %v648_v32, %v2265_v12 }
 0x118   : > { %v654_v37 = vadd.f32 1e-05, %v652_v35 }
 0x11a   : > { %2010 = vrsqrt.f32 %v654_v37  ;;  %vm662_vm4 = vweird.f32 %v654_v37 }
 0x11d   : > { %v651_v38 = vpop.xlane.xlu1 %650 }
 0x11e   : > { %v653_v39 = vmul.f32 %v651_v38, %v2265_v12 }
 0x120   : > { %v2011_v40 = vpop.eup %2010  ;;  %v655_v41 = vadd.f32 1e-05, %v653_v39 }
 0x121   : > { %v657_v42 = vmul.f32 %v2011_v40, %v654_v37  ;;  %vm663_vm3 = vweird.f32 %v2011_v40 }
 0x122   : > { %2012 = vrsqrt.f32 %v655_v41  ;;  %vm664_vm5 = vmor %vm662_vm4, %vm663_vm3  ;;  %vm672_vm7 = vweird.f32 %v655_v41 }
 0x123   : > { %v658_v43 = vmul.f32 %v2011_v40, %v657_v42 }
 0x125   : > { %v659_v44 = vmul.f32 0.5, %v658_v43 }
 0x127   : > { %v660_v45 = vsub.f32 1.5, %v659_v44 }
 0x128   : > { %v2013_v46 = vpop.eup %2012 }
 0x129   : > { %v661_v47 = vmul.f32 %v2011_v40, %v660_v45  ;;  %v667_v48 = vmul.f32 %v2013_v46, %v655_v41  ;;  %vm673_vm6 = vweird.f32 %v2013_v46 }
 0x12a   : > { %vm674_vm8 = vmor %vm672_vm7, %vm673_vm6 }
 0x12b   : > { %v668_v49 = vmul.f32 %v2013_v46, %v667_v48  ;;  %v665_v50 = vsel %vm664_vm5, %v2011_v40, %v661_v47 }
 0x12c   : > { %v676_v53 = vmul.f32 %v665_v50, %v642_v15 }
 0x12d   : > { %v669_v51 = vmul.f32 0.5, %v668_v49 }
 0x12e   : > { %v681_v58 = vmul.f32 %v2001_v54, %v676_v53 }
 0x12f   : > { %v670_v52 = vsub.f32 1.5, %v669_v51 }
 0x130   : > { %v686_v61 = vadd.f32 %v2002_v59, %v681_v58 }
 0x131   : > { %v671_v55 = vmul.f32 %v2013_v46, %v670_v52 }
 0x133   : > { %v675_v56 = vsel %vm674_vm8, %v2013_v46, %v671_v55 }
 0x134   : > { %v677_v57 = vmul.f32 %v675_v56, %v643_v20 }
 0x136   : > { %v682_v60 = vmul.f32 %v2001_v54, %v677_v57 }
 0x138   : > { %v687_v62 = vadd.f32 %v2002_v59, %v682_v60 }
 0x13a   : > { %v688_v63 = vpack.c.bf16 %v687_v62, %v686_v61 }
 0x13c   : > { %1875 = vmatmul.msk.bf16.vlgmr.msra.gmra.mxu0 %vm626_vm1, %v688_v63  ;;  %1876 = vmatmul.msk.bf16.vlgmr.msra.gmra.mxu1 %vm626_vm1, %v688_v63 }
 0x1b9   : > { %v725_v0 = vpop.f32.mrf.mxu0  ;;  %v739_v1 = vpop.f32.mrf.mxu1 }
 0x1ba   : > { %v2295_v3 = vpack.c.bf16 %v739_v1, %v725_v0 }
 0x1bc   : > { %v750_v5 = vunpack.c.l.b16 %v2295_v3  ;;  %v748_v6 = vrot.slane %v2295_v3, 4 }
 0x1be   : > { %v751_v7 = vpack.c.b16 %v750_v5, %v750_v5  ;;  %v853_v8 = vsel %vm851_vm9, %v748_v6, 0 }
 0x1bf   : > { %862 = vmatpush.bf16.msrb.mxu0 %v853_v8 }
 0x1c0   : > { %895 = vrot.lane.b32.xlu0 %v751_v7, %s2101_s14  ;;  %752 = vrot.lane.b32.xlu2 %v751_v7, %s2102_s18 }
 0x1c1   : > { %v727_v9 = vpop.f32.mrf.mxu0  ;;  %v741_v10 = vpop.f32.mrf.mxu1 }
 0x1c2   : > { %v2301_v11 = vpack.c.bf16 %v741_v10, %v727_v9 }
 0x1c4   : > { %v774_v13 = vunpack.c.l.b16 %v2301_v11  ;;  %v749_v14 = vrot.slane %v2301_v11, 4 }
 0x1c6   : > { %v775_v15 = vpack.c.b16 %v774_v13, %v774_v13  ;;  %v872_v16 = vsel %vm851_vm9, %v749_v14, 0 }
 0x1c7   : > { %881 = vmatpush.bf16.msrb.mxu1 %v872_v16 }
 0x1c8   : > { %1058 = vrot.lane.b32.xlu0 %v775_v15, %s2103_s20  ;;  %918 = vrot.lane.b32.xlu1 %v775_v15, %s2101_s14 }
 0x1c9   : > { %776 = vrot.lane.b32.xlu2 %v775_v15, %s2102_s18 }
 0x1d0   : > { %1175 = vrot.lane.b32.xlu0 %v751_v7, %s2104_s25  ;;  %1056 = vrot.lane.b32.xlu1 %v775_v15, %s2105_s3 }
 0x1d1   : > { %893 = vrot.lane.b32.xlu2 %v751_v7, %s2106_s23 }
 0x1d8   : > { %1196 = vrot.lane.b32.xlu0 %v775_v15, %s2107_s22  ;;  %1173 = vrot.lane.b32.xlu1 %v751_v7, %s2107_s22 }
 0x1d9   : > { %916 = vrot.lane.b32.xlu2 %v775_v15, %s2106_s23 }
 0x1e1   : > { %1035 = vrot.lane.b32.xlu2 %v751_v7, %s2103_s20 }
 0x1e9   : > { %1033 = vrot.lane.b32.xlu2 %v751_v7, %s2105_s3 }
 0x1f1   : > { %1198 = vrot.lane.b32.xlu2 %v775_v15, %s2104_s25 }
 0x21a   : > { %v753_v17 = vpop.permute.xlu2 %752 }
 0x21b   : > { %v759_v18 = vsel %vm754_vm10, %v753_v17, 0 }
 0x21c   : > { %768 = vmatpush.bf16.xpose.msra.mxu2 %v759_v18 }
 0x223   : > { %v777_v19 = vpop.permute.xlu2 %776  ;;  %1877 = vmatmul.msk.bf16.vlgmr.msra.gmra.mxu2 %vm754_vm10, %v2295_v3 }
 0x224   : > { %v782_v20 = vsel %vm754_vm10, %v777_v19, 0 }
 0x225   : > { %791 = vmatpush.bf16.xpose.msra.mxu3 %v782_v20 }
 0x22b   : > { %v894_v21 = vpop.permute.xlu2 %893 }
 0x22c   : > { %1878 = vmatmul.msk.bf16.vlgmr.msra.gmra.mxu3 %vm754_vm10, %v2301_v11 }
 0x232   : > { %v896_v22 = vpop.permute.xlu0 %895 }
 0x233   : > { %v917_v23 = vpop.permute.xlu2 %916  ;;  %v901_v24 = vsel %vm754_vm10, %v896_v22, 0 }
 0x234   : > { %910 = vmatpush.bf16.xpose.msrb.mxu2 %v901_v24 }
 0x23a   : > { %v1059_v25 = vpop.permute.xlu0 %1058  ;;  %v919_v26 = vpop.permute.xlu1 %918 }
 0x23b   : > { %v1064_v27 = vsel %vm754_vm10, %v1059_v25, 0  ;;  %v1036_v28 = vpop.permute.xlu2 %1035  ;;  %1881 = vmatmul.msk.bf16.vlgmr.msrb.gmra.mxu2 %vm754_vm10, %v894_v21  ;;  %v924_v29 = vsel %vm754_vm10, %v919_v26, 0 }
 0x23c   : > { %v1041_v30 = vsel %vm754_vm10, %v1036_v28, 0  ;;  %933 = vmatpush.bf16.xpose.msrb.mxu3 %v924_v29 }
 0x23d   : > { %1050 = vmatpush.bf16.xpose.msra.mxu2 %v1041_v30 }
 0x242   : > { %v1176_v31 = vpop.permute.xlu0 %1175  ;;  %v1057_v36 = vpop.permute.xlu1 %1056 }
 0x243   : > { %v1181_v32 = vsel %vm754_vm10, %v1176_v31, 0  ;;  %v1034_v33 = vpop.permute.xlu2 %1033  ;;  %1882 = vmatmul.msk.bf16.vlgmr.msrb.gmra.mxu3 %vm754_vm10, %v917_v23 }
 0x244   : > { %1073 = vmatpush.bf16.xpose.msra.mxu3 %v1064_v27 }
 0x245   : > { %1190 = vmatpush.bf16.xpose.msrb.mxu2 %v1181_v32 }
 0x24a   : > { %v1174_v37 = vpop.permute.xlu1 %1173  ;;  %v1197_v38 = vpop.permute.xlu0 %1196 }
 0x24b   : > { %v1199_v34 = vpop.permute.xlu2 %1198  ;;  %1885 = vmatmul.msk.bf16.vlgmr.msra.gmra.mxu2 %vm754_vm10, %v1034_v33 }
 0x24c   : > { %v1204_v35 = vsel %vm754_vm10, %v1199_v34, 0 }
 0x24d   : > { %1213 = vmatpush.bf16.xpose.msrb.mxu3 %v1204_v35 }
 0x253   : > { %1886 = vmatmul.msk.bf16.vlgmr.msra.gmra.mxu3 %vm754_vm10, %v1057_v36 }
 0x25b   : > { %1889 = vmatmul.msk.bf16.vlgmr.msrb.gmra.mxu2 %vm754_vm10, %v1174_v37 }
 0x263   : > { %1890 = vmatmul.msk.bf16.vlgmr.msrb.gmra.mxu3 %vm754_vm10, %v1197_v38 }
 0x2a6   : > { %v770_v39 = vpop.f32.mrf.mxu2 }
 0x2a7   : > { %v798_v40 = vsel %vm797_vm11, %v770_v39, -inf }
 0x2a8   : > { %799 = vmax.xlane.f32.xlu2 %v798_v40 }
 0x2ae   : > { %v772_v41 = vpop.f32.mrf.mxu2 }
 0x2af   : > { %v793_v42 = vpop.f32.mrf.mxu3 }
 0x2b0   : > { %v801_v43 = vsel %vm797_vm11, %v793_v42, -inf }
 0x2b1   : > { %802 = vmax.xlane.f32.xlu1 %v801_v43 }
 0x2b7   : > { %v795_v44 = vpop.f32.mrf.mxu3 }
 0x2be   : > { %v912_v45 = vpop.f32.mrf.mxu2 }
 0x2bf   : > { %v939_v46 = vsel %vm797_vm11, %v912_v45, -inf }
 0x2c0   : > { %940 = vmax.xlane.f32.xlu0 %v939_v46 }
 0x2c6   : > { %v914_v47 = vpop.f32.mrf.mxu2  ;;  %v935_v48 = vpop.f32.mrf.mxu3 }
 0x2c7   : > { %v942_v49 = vsel %vm797_vm11, %v935_v48, -inf }
 0x2c8   : > { %943 = vmax.xlane.f32.xlu2 %v942_v49 }
 0x2ce   : > { %v937_v50 = vpop.f32.mrf.mxu3  ;;  %v1052_v51 = vpop.f32.mrf.mxu2 }
 0x2cf   : > { %v1079_v52 = vsel %vm797_vm11, %v1052_v51, -inf }
 0x2d0   : > { %1080 = vmax.xlane.f32.xlu1 %v1079_v52 }
 0x2d6   : > { %v1054_v53 = vpop.f32.mrf.mxu2  ;;  %v1075_v54 = vpop.f32.mrf.mxu3 }
 0x2d7   : > { %v1082_v55 = vsel %vm797_vm11, %v1075_v54, -inf }
 0x2d8   : > { %1083 = vmax.xlane.f32.xlu0 %v1082_v55 }
 0x2de   : > { %v1077_v56 = vpop.f32.mrf.mxu3  ;;  %v2341_v57 = vpop.f32.mrf.mxu2 }
 0x2df   : > { %v1219_v62 = vsel %vm797_vm11, %v2341_v57, -inf }
 0x2e0   : > { %887 = vrot.lane.b32.xlu2 %v2295_v3, %s2106_s23 }
 0x2e6   : > { %v1194_v58 = vpop.f32.mrf.mxu2  ;;  %v1215_v59 = vpop.f32.mrf.mxu3 }
 0x2e7   : > { %v1222_v60 = vsel %vm797_vm11, %v1215_v59, -inf }
 0x2e8   : > { %1223 = vmax.xlane.f32.xlu1 %v1222_v60 }
 0x2ee   : > { %v1217_v61 = vpop.f32.mrf.mxu3 }
 0x309   : > { %1220 = vmax.xlane.f32.xlu2 %v1219_v62 }
 0x31b   : > { %v800_v63 = vpop.xlane.xlu2 %799 }
 0x31c   : > { %v804_v0 = vsub.f32 %v770_v39, %v800_v63 }
 0x31e   : > { %v806_v1 = vmul.f32 1.442695, %v804_v0 }
 0x320   : > { %2014 = vpow2.f32 %v806_v1 }
 0x324   : > { %v803_v5 = vpop.xlane.xlu1 %802 }
 0x325   : > { %v805_v6 = vsub.f32 %v793_v42, %v803_v5 }
 0x326   : > { %v2348_v7 = vpop.eup %2014 }
 0x327   : > { %v808_v8 = vmul.f32 1.442695, %v805_v6  ;;  %v810_v9 = vsel %vm797_vm11, %v2348_v7, 0.0 }
 0x328   : > { %811 = vadd.xlane.f32.xlu0 %v810_v9 }
 0x329   : > { %2016 = vpow2.f32 %v808_v8 }
 0x32f   : > { %v2352_v10 = vpop.eup %2016 }
 0x330   : > { %v813_v13 = vsel %vm797_vm11, %v2352_v10, 0.0 }
 0x331   : > { %814 = vadd.xlane.f32.xlu2 %v813_v13 }
 0x333   : > { %v941_v14 = vpop.xlane.xlu0 %940 }
 0x334   : > { %v945_v15 = vsub.f32 %v912_v45, %v941_v14 }
 0x336   : > { %v947_v16 = vmul.f32 1.442695, %v945_v15 }
 0x338   : > { %2018 = vpow2.f32 %v947_v16 }
 0x33b   : > { %v944_v17 = vpop.xlane.xlu2 %943 }
 0x33c   : > { %1027 = vrot.lane.b32.xlu0 %v2295_v3, %s2105_s3  ;;  %v946_v23 = vsub.f32 %v935_v48, %v944_v17 }
 0x33e   : > { %v2358_v18 = vpop.eup %2018  ;;  %v949_v25 = vmul.f32 1.442695, %v946_v23 }
 0x33f   : > { %v951_v19 = vsel %vm797_vm11, %v2358_v18, 0.0 }
 0x340   : > { %952 = vadd.xlane.f32.xlu1 %v951_v19  ;;  %2020 = vpow2.f32 %v949_v25 }
 0x343   : > { %v888_v20 = vpop.permute.xlu2 %887  ;;  %v1081_v24 = vpop.xlane.xlu1 %1080 }
 0x344   : > { %v891_v21 = vrot.slane %v888_v20, 4  ;;  %v1085_v26 = vsub.f32 %v1052_v51, %v1081_v24 }
 0x346   : > { %v993_v22 = vsel %vm851_vm9, %v891_v21, 0  ;;  %v1087_v28 = vmul.f32 1.442695, %v1085_v26  ;;  %v2367_v31 = vpop.eup %2020 }
 0x347   : > { %1002 = vmatpush.bf16.msra.mxu0 %v993_v22  ;;  %v954_v34 = vsel %vm797_vm11, %v2367_v31, 0.0 }
 0x348   : > { %2022 = vpow2.f32 %v1087_v28 }
 0x349   : > { %1029 = vrot.lane.b32.xlu2 %v2301_v11, %s2105_s3 }
 0x34b   : > { %v1084_v30 = vpop.xlane.xlu0 %1083 }
 0x34c   : > { %v1086_v32 = vsub.f32 %v1075_v54, %v1084_v30 }
 0x34e   : > { %v1089_v35 = vmul.f32 1.442695, %v1086_v32  ;;  %v2371_v36 = vpop.eup %2022 }
 0x34f   : > { %v1091_v37 = vsel %vm797_vm11, %v2371_v36, 0.0 }
 0x359   : > { %889 = vrot.lane.b32.xlu1 %v2301_v11, %s2106_s23 }
 0x35b   : > { %v1224_v27 = vpop.xlane.xlu1 %1223 }
 0x35c   : > { %v1226_v29 = vsub.f32 %v1215_v59, %v1224_v27 }
 0x35e   : > { %v1229_v33 = vmul.f32 1.442695, %v1226_v29 }
 0x360   : > { %2024 = vpow2.f32 %v1229_v33 }
 0x361   : > { %2026 = vpow2.f32 %v1089_v35 }
 0x366   : > { %955 = vadd.xlane.f32.xlu0 %v954_v34  ;;  %v2375_v38 = vpop.eup %2024 }
 0x367   : > { %v1234_v39 = vsel %vm797_vm11, %v2375_v38, 0.0  ;;  %v2379_v40 = vpop.eup %2026 }
 0x368   : > { %v1094_v41 = vsel %vm797_vm11, %v2379_v40, 0.0 }
 0x36e   : > { %1092 = vadd.xlane.f32.xlu0 %v1091_v37 }
 0x372   : > { %1235 = vadd.xlane.f32.xlu2 %v1234_v39 }
 0x376   : > { %1095 = vadd.xlane.f32.xlu0 %v1094_v41 }
 0x37c   : > { %v1221_v42 = vpop.xlane.xlu2 %1220 }
 0x37d   : > { %v1225_v43 = vsub.f32 %v2341_v57, %v1221_v42 }
 0x37f   : > { %v1227_v44 = vmul.f32 1.442695, %v1225_v43 }
 0x381   : > { %2028 = vpow2.f32 %v1227_v44 }
 0x387   : > { %v2384_v45 = vpop.eup %2028 }
 0x388   : > { %v1231_v46 = vsel %vm797_vm11, %v2384_v45, 0.0 }
 0x389   : > { %1232 = vadd.xlane.f32.xlu1 %v1231_v46 }
 0x38a   : > { %1167 = vrot.lane.b32.xlu0 %v2295_v3, %s2107_s22 }
 0x392   : > { %1169 = vrot.lane.b32.xlu0 %v2301_v11, %s2107_s22 }
 0x39b   : > { %v812_v47 = vpop.xlane.xlu0 %811 }
 0x39c   : > { %2030 = vrcp.f32 %v812_v47  ;;  %v827_v52 = vand.u32 2147483648, %v812_v47  ;;  %v825_v54 = vand.u32 2147483647, %v812_v47  ;;  %vm821_vm13 = vweird.f32 %v812_v47 }
 0x39e   : > { %v828_v56 = vor.u32 1.1754944e-38, %v827_v52  ;;  %vm826_vm15 = vcmp.eq.f32.partialorder %v825_v54, 8.507059e+37 }
 0x3a2   : > { %v2031_v48 = vpop.eup %2030 }
 0x3a3   : > { %v817_v49 = vmul.f32 %v2031_v48, %v812_v47  ;;  %vm822_vm12 = vweird.f32 %v2031_v48 }
 0x3a4   : > { %v815_v50 = vpop.xlane.xlu2 %814  ;;  %vm823_vm14 = vmor %vm821_vm13, %vm822_vm12 }
 0x3a5   : > { %v818_v51 = vsub.f32 1.0, %v817_v49  ;;  %2032 = vrcp.f32 %v815_v50  ;;  %v842_v1 = vand.u32 2147483648, %v815_v50  ;;  %v840_v5 = vand.u32 2147483647, %v815_v50 }
 0x3a6   : > { %vm836_vm2 = vweird.f32 %v815_v50 }
 0x3a7   : > { %v819_v53 = vmul.f32 %v2031_v48, %v818_v51  ;;  %v843_v13 = vor.u32 1.1754944e-38, %v842_v1  ;;  %vm841_vm4 = vcmp.eq.f32.partialorder %v840_v5, 8.507059e+37 }
 0x3a9   : > { %v820_v55 = vadd.f32 %v2031_v48, %v819_v53 }
 0x3ab   : > { %v2033_v57 = vpop.eup %2032  ;;  %v824_v3 = vsel %vm823_vm14, %v2031_v48, %v820_v55 }
 0x3ac   : > { %v832_v58 = vmul.f32 %v2033_v57, %v815_v50  ;;  %v829_v11 = vsel %vm826_vm15, %v828_v56, %v824_v3  ;;  %vm837_vm0 = vweird.f32 %v2033_v57  ;;  %v1030_v29 = vpop.permute.xlu2 %1029 }
 0x3ad   : > { %v830_v59 = vmul.f32 %v2348_v7, %v829_v11  ;;  %vm838_vm3 = vmor %vm836_vm2, %vm837_vm0  ;;  %v1032_v30 = vrot.slane %v1030_v29, 4 }
 0x3ae   : > { %v833_v60 = vsub.f32 1.0, %v832_v58  ;;  %v1028_v61 = vpop.permute.xlu0 %1027 }
 0x3af   : > { %v1031_v62 = vrot.slane %v1028_v61, 4  ;;  %v846_v63 = vpack.c.bf16 %v830_v59, %v830_v59  ;;  %v1152_v35 = vsel %vm851_vm9, %v1032_v30, 0 }
 0x3b0   : > { %v834_v0 = vmul.f32 %v2033_v57, %v833_v60 }
 0x3b1   : > { %v1133_v6 = vsel %vm851_vm9, %v1031_v62, 0  ;;  %1879 = vmatmul.msk.bf16.vlgmr.msrb.gmra.mxu0 %vm797_vm11, %v846_v63 }
 0x3b2   : > { %v835_v8 = vadd.f32 %v2033_v57, %v834_v0  ;;  %1142 = vmatpush.bf16.msrb.mxu0 %v1133_v6 }
 0x3b3   : > { %v953_v9 = vpop.xlane.xlu1 %952 }
 0x3b4   : > { %2034 = vrcp.f32 %v953_v9  ;;  %v839_v7 = vsel %vm838_vm3, %v2033_v57, %v835_v8  ;;  %v968_v21 = vand.u32 2147483648, %v953_v9  ;;  %v966_v23 = vand.u32 2147483647, %v953_v9 }
 0x3b5   : > { %v844_v14 = vsel %vm841_vm4, %v843_v13, %v839_v7  ;;  %vm962_vm6 = vweird.f32 %v953_v9 }
 0x3b6   : > { %v845_v15 = vmul.f32 %v2352_v10, %v844_v14  ;;  %v969_v25 = vor.u32 1.1754944e-38, %v968_v21  ;;  %vm967_vm8 = vcmp.eq.f32.partialorder %v966_v23, 8.507059e+37 }
 0x3b8   : > { %v847_v16 = vpack.c.bf16 %v845_v15, %v845_v15 }
 0x3ba   : > { %v2035_v17 = vpop.eup %2034  ;;  %1880 = vmatmul.msk.bf16.vlgmr.msrb.gmra.mxu1 %vm797_vm11, %v847_v16 }
 0x3bb   : > { %v958_v19 = vmul.f32 %v2035_v17, %v953_v9  ;;  %vm963_vm5 = vweird.f32 %v2035_v17 }
 0x3bc   : > { %vm964_vm7 = vmor %vm962_vm6, %vm963_vm5 }
 0x3bd   : > { %v959_v20 = vsub.f32 1.0, %v958_v19 }
 0x3bf   : > { %v960_v22 = vmul.f32 %v2035_v17, %v959_v20 }
 0x3c1   : > { %v961_v24 = vadd.f32 %v2035_v17, %v960_v22 }
 0x3c3   : > { %v965_v26 = vsel %vm964_vm7, %v2035_v17, %v961_v24 }
 0x3c4   : > { %v970_v27 = vsel %vm967_vm8, %v969_v25, %v965_v26 }
 0x3c5   : > { %v971_v28 = vmul.f32 %v2358_v18, %v970_v27 }
 0x3c7   : > { %v987_v10 = vpack.c.bf16 %v971_v28, %v971_v28 }
 0x3c9   : > { %1883 = vmatmul.msk.bf16.vlgmr.msra.gmra.mxu0 %vm797_vm11, %v987_v10 }
 0x3cb   : > { %v890_v32 = vpop.permute.xlu1 %889 }
 0x3cc   : > { %v892_v33 = vrot.slane %v890_v32, 4 }
 0x3ce   : > { %v1012_v34 = vsel %vm851_vm9, %v892_v33, 0 }
 0x3cf   : > { %1021 = vmatpush.bf16.msra.mxu1 %v1012_v34 }
 0x3d3   : > { %1161 = vmatpush.bf16.msrb.mxu1 %v1152_v35 }
 0x3d9   : > { %v956_v37 = vpop.xlane.xlu0 %955 }
 0x3da   : > { %2036 = vrcp.f32 %v956_v37  ;;  %v983_v43 = vand.u32 2147483648, %v956_v37  ;;  %v981_v46 = vand.u32 2147483647, %v956_v37  ;;  %vm977_vm13 = vweird.f32 %v956_v37 }
 0x3dc   : > { %v984_v49 = vor.u32 1.1754944e-38, %v983_v43  ;;  %vm982_vm15 = vcmp.eq.f32.partialorder %v981_v46, 8.507059e+37 }
 0x3e0   : > { %v2037_v39 = vpop.eup %2036 }
 0x3e1   : > { %v973_v41 = vmul.f32 %v2037_v39, %v956_v37  ;;  %v1093_v42 = vpop.xlane.xlu0 %1092  ;;  %vm978_vm12 = vweird.f32 %v2037_v39 }
 0x3e2   : > { %2038 = vrcp.f32 %v1093_v42  ;;  %vm979_vm14 = vmor %vm977_vm13, %vm978_vm12  ;;  %v1108_v57 = vand.u32 2147483648, %v1093_v42  ;;  %v1106_v58 = vand.u32 2147483647, %v1093_v42  ;;  %vm1102_vm2 = vweird.f32 %v1093_v42 }
 0x3e3   : > { %v974_v18 = vsub.f32 1.0, %v973_v41 }
 0x3e4   : > { %v1109_v61 = vor.u32 1.1754944e-38, %v1108_v57  ;;  %vm1107_vm4 = vcmp.eq.f32.partialorder %v1106_v58, 8.507059e+37 }
 0x3e5   : > { %v975_v44 = vmul.f32 %v2037_v39, %v974_v18  ;;  %v2401_v50 = vpop.xlane.xlu2 %1235 }
 0x3e6   : > { %v1263_v27 = vand.u32 2147483648, %v2401_v50  ;;  %vm1257_vm13 = vweird.f32 %v2401_v50  ;;  %v1261_v28 = vand.u32 2147483647, %v2401_v50 }
 0x3e7   : > { %v976_v47 = vadd.f32 %v2037_v39, %v975_v44 }
 0x3e8   : > { %v2039_v48 = vpop.eup %2038  ;;  %v1264_v32 = vor.u32 1.1754944e-38, %v1263_v27  ;;  %v2003_v27 = vld [vmem:[%s2555_s24] ss:$0 sm:$0xff] }
 0x3e9   : > { %v980_v51 = vsel %vm979_vm14, %v2037_v39, %v976_v47  ;;  %v1098_v52 = vmul.f32 %v2039_v48, %v1093_v42  ;;  %v1096_v53 = vpop.xlane.xlu0 %1095  ;;  %vm1103_vm0 = vweird.f32 %v2039_v48 }
 0x3ea   : > { %v985_v54 = vsel %vm982_vm15, %v984_v49, %v980_v51  ;;  %2040 = vrcp.f32 %v1096_v53  ;;  %vm1104_vm3 = vmor %vm1102_vm2, %vm1103_vm0  ;;  %v1123_v8 = vand.u32 2147483648, %v1096_v53  ;;  %v1121_v13 = vand.u32 2147483647, %v1096_v53 }
 0x3eb   : > { %v986_v55 = vmul.f32 %v2367_v31, %v985_v54  ;;  %v1099_v56 = vsub.f32 1.0, %v1098_v52  ;;  %2042 = vrcp.f32 %v2401_v50  ;;  %vm1117_vm6 = vweird.f32 %v1096_v53 }
 0x3ec   : > { %v1124_v16 = vor.u32 1.1754944e-38, %v1123_v8  ;;  %vm1122_vm8 = vcmp.eq.f32.partialorder %v1121_v13, 8.507059e+37  ;;  %vm1262_vm15 = vcmp.eq.f32.partialorder %v1261_v28, 8.507059e+37  ;;  %v1951_v8 = vld [vmem:[%s2221_s29] sm:$0xff] }
 0x3ed   : > { %v1100_v3 = vmul.f32 %v2039_v48, %v1099_v56  ;;  %v988_v11 = vpack.c.bf16 %v986_v55, %v986_v55 }
 0x3ef   : > { %v1101_v59 = vadd.f32 %v2039_v48, %v1100_v3  ;;  %1884 = vmatmul.msk.bf16.vlgmr.msra.gmra.mxu1 %vm797_vm11, %v988_v11 }
 0x3f0   : > { %v2041_v60 = vpop.eup %2040 }
 0x3f1   : > { %v2043_v62 = vpop.eup %2042  ;;  %v1105_v63 = vsel %vm1104_vm3, %v2039_v48, %v1101_v59  ;;  %v1113_v0 = vmul.f32 %v2041_v60, %v1096_v53  ;;  %vm1118_vm5 = vweird.f32 %v2041_v60 }
 0x3f2   : > { %v1110_v31 = vsel %vm1107_vm4, %v1109_v61, %v1105_v63  ;;  %v1253_v6 = vmul.f32 %v2043_v62, %v2401_v50  ;;  %vm1119_vm7 = vmor %vm1117_vm6, %vm1118_vm5  ;;  %vm1258_vm12 = vweird.f32 %v2043_v62 }
 0x3f3   : > { %v1111_v1 = vmul.f32 %v2371_v36, %v1110_v31  ;;  %v1114_v5 = vsub.f32 1.0, %v1113_v0  ;;  %vm1259_vm14 = vmor %vm1257_vm13, %vm1258_vm12 }
 0x3f4   : > { %v1254_v15 = vsub.f32 1.0, %v1253_v6  ;;  %v1952_v6 = vld [vmem:[%s2221_s29 + $0x8] sm:$0xff] }
 0x3f5   : > { %v1115_v9 = vmul.f32 %v2041_v60, %v1114_v5  ;;  %v1127_v7 = vpack.c.bf16 %v1111_v1, %v1111_v1  ;;  %v1954_v1 = vld [vmem:[%s2221_s29 + $0x18] sm:$0xff]  ;;  %v1953_v5 = vld [vmem:[%s2221_s29 + $0x10] sm:$0xff] }
 0x3f6   : > { %v1255_v20 = vmul.f32 %v2043_v62, %v1254_v15  ;;  %1383 = vmatpush.bf16.msra.mxu2 %v1954_v1  ;;  %v2005_v1 = vld [vmem:[%s595_s13] ss:$0 sm:$0xff] }
 0x3f7   : > { %v1116_v14 = vadd.f32 %v2041_v60, %v1115_v9  ;;  %1887 = vmatmul.msk.bf16.vlgmr.msrb.gmra.mxu0 %vm797_vm11, %v1127_v7 }
 0x3f8   : > { %v1256_v26 = vadd.f32 %v2043_v62, %v1255_v20 }
 0x3f9   : > { %v1120_v17 = vsel %vm1119_vm7, %v2041_v60, %v1116_v14 }
 0x3fa   : > { %v1125_v19 = vsel %vm1122_vm8, %v1124_v16, %v1120_v17  ;;  %v1260_v10 = vsel %vm1259_vm14, %v2043_v62, %v1256_v26  ;;  %1384 = vmatpush.bf16.msra.mxu2 %v1953_v5 }
 0x3fb   : > { %v1126_v36 = vmul.f32 %v2379_v40, %v1125_v19  ;;  %v1265_v35 = vsel %vm1262_vm15, %v1264_v32, %v1260_v10 }
 0x3fc   : > { %v1168_v21 = vpop.permute.xlu0 %1167  ;;  %v1233_v22 = vpop.xlane.xlu1 %1232  ;;  %v1266_v18 = vmul.f32 %v2375_v38, %v1265_v35 }
 0x3fd   : > { %v1171_v23 = vrot.slane %v1168_v21, 4  ;;  %2044 = vrcp.f32 %v1233_v22  ;;  %v1128_v24 = vpack.c.bf16 %v1126_v36, %v1126_v36  ;;  %v1248_v37 = vand.u32 2147483648, %v1233_v22 }
 0x3fe   : > { %v1246_v42 = vand.u32 2147483647, %v1233_v22  ;;  %vm1242_vm2 = vweird.f32 %v1233_v22  ;;  %v1268_v49 = vpack.c.bf16 %v1266_v18, %v1266_v18  ;;  %1385 = vmatpush.bf16.msra.mxu2 %v1952_v6 }
 0x3ff   : > { %v1273_v25 = vsel %vm851_vm9, %v1171_v23, 0  ;;  %1888 = vmatmul.msk.bf16.vlgmr.msrb.gmra.mxu1 %vm797_vm11, %v1128_v24  ;;  %v1249_v44 = vor.u32 1.1754944e-38, %v1248_v37 }
 0x400   : > { %1282 = vmatpush.bf16.msra.mxu0 %v1273_v25  ;;  %vm1247_vm4 = vcmp.eq.f32.partialorder %v1246_v42, 8.507059e+37 }
 0x402   : > { %1386 = vmatpush.bf16.msra.mxu2 %v1951_v8 }
 0x403   : > { %v2045_v40 = vpop.eup %2044 }
 0x404   : > { %v1238_v29 = vmul.f32 %v2045_v40, %v1233_v22  ;;  %v1170_v30 = vpop.permute.xlu0 %1169  ;;  %vm1243_vm0 = vweird.f32 %v2045_v40 }
 0x405   : > { %v1172_v33 = vrot.slane %v1170_v30, 4  ;;  %vm1244_vm3 = vmor %vm1242_vm2, %vm1243_vm0 }
 0x406   : > { %v1239_v34 = vsub.f32 1.0, %v1238_v29 }
 0x407   : > { %v1292_v39 = vsel %vm851_vm9, %v1172_v33, 0  ;;  %vm1335_vm9 = vcmask 392192  }
 0x408   : > { %v1240_v41 = vmul.f32 %v2045_v40, %v1239_v34  ;;  %1301 = vmatpush.bf16.msra.mxu1 %v1292_v39 }
 0x40a   : > { %v1241_v43 = vadd.f32 %v2045_v40, %v1240_v41 }
 0x40c   : > { %v1245_v46 = vsel %vm1244_vm3, %v2045_v40, %v1241_v43 }
 0x40d   : > { %v1250_v47 = vsel %vm1247_vm4, %v1249_v44, %v1245_v46 }
 0x40e   : > { %v1251_v48 = vmul.f32 %v2384_v45, %v1250_v47  ;;  %v1956_v47 = vld [vmem:[%s2239_s12 + $0x8] sm:$0xff] }
 0x40f   : > { %1892 = vmatmul.msk.bf16.vlgmr.msra.gmra.mxu1 %vm797_vm11, %v1268_v49  ;;  %1481 = vmatpush.bf16.msra.mxu3 %v1956_v47 }
 0x410   : > { %v1267_v50 = vpack.c.bf16 %v1251_v48, %v1251_v48 }
 0x412   : > { %1891 = vmatmul.msk.bf16.vlgmr.msra.gmra.mxu0 %vm797_vm11, %v1267_v50  ;;  %vm1375_vm11 = vcmask 523264   ;;  %v1955_v50 = vld [vmem:[%s2239_s12] sm:$0xff] }
 0x413   : > { %1482 = vmatpush.bf16.msra.mxu3 %v1955_v50 }
 0x42e   : > { %v864_v51 = vpop.f32.mrf.mxu0 }
 0x436   : > { %v866_v52 = vpop.f32.mrf.mxu0 }
 0x437   : > { %v883_v53 = vpop.f32.mrf.mxu1 }
 0x43f   : > { %v885_v54 = vpop.f32.mrf.mxu1 }
 0x446   : > { %v1004_v38 = vpop.f32.mrf.mxu0 }
 0x44e   : > { %v1006_v55 = vpop.f32.mrf.mxu0 }
 0x46c   : > { %v1023_v56 = vpop.f32.mrf.mxu1 }
 0x46d   : > { %v1986_v57 = vpack.i.bf16 %v1023_v56, %v1004_v38 }
 0x46f   : > { %1987 = vrot.lane.b32.xlu0 %v1986_v57, %s2104_s25  ;;  %s2557_s25 = sld [smem:[#allocation10_spill]] (!%p1938_p5) }
 0x474   : > { %v1144_v3 = vpop.f32.mrf.mxu0  ;;  %v1025_v45 = vpop.f32.mrf.mxu1 }
 0x47c   : > { %v1146_v58 = vpop.f32.mrf.mxu0  ;;  %v1163_v11 = vpop.f32.mrf.mxu1 }
 0x47d   : > { %v1991_v59 = vpack.i.bf16 %v1163_v11, %v1144_v3 }
 0x47f   : > { %1992 = vrot.lane.b32.xlu0 %v1991_v59, %s2103_s20 }
 0x484   : > { %v1165_v60 = vpop.f32.mrf.mxu1 }
 0x48c   : > { %v1303_v61 = vpop.f32.mrf.mxu1 }
 0x48f   : > { %v1284_v62 = vpop.f32.mrf.mxu0 }
 0x490   : > { %v1996_v63 = vpack.i.bf16 %v1303_v61, %v1284_v62  ;;  %v2004_v62 = vld [vmem:[%s592_s19] ss:$0 sm:$0xff] }
 0x492   : > { %1997 = vrot.lane.b32.xlu1 %v1996_v63, %s2101_s14 }
 0x494   : > { %v1305_v0 = vpop.f32.mrf.mxu1 }
 0x497   : > { %v1286_v31 = vpop.f32.mrf.mxu0 }
 0x4e1   : > { %v1988_v9 = vpop.permute.xlu0 %1987 }
 0x4e2   : > { %v1990_v7 = vunpack.i.h.bf16 %v1988_v9  ;;  %v1989_v14 = vunpack.i.l.bf16 %v1988_v9 }
 0x4e4   : > { %v1332_v19 = vsel %vm754_vm10, %v883_v53, %v1990_v7  ;;  %v1331_v36 = vsel %vm754_vm10, %v864_v51, %v1989_v14  ;;  %v2006_v14 = vld [vmem:[%s603_s26] ss:$0 sm:$0xff] }
 0x4f1   : > { %v1993_v13 = vpop.permute.xlu0 %1992 }
 0x4f2   : > { %v1995_v15 = vunpack.i.h.bf16 %v1993_v13  ;;  %v1994_v16 = vunpack.i.l.bf16 %v1993_v13 }
 0x4f4   : > { %v1334_v22 = vsel %vm626_vm1, %v1332_v19, %v1995_v15  ;;  %v1333_v23 = vsel %vm626_vm1, %v1331_v36, %v1994_v16 }
 0x504   : > { %v1998_v17 = vpop.permute.xlu1 %1997 }
 0x505   : > { %v2000_v20 = vunpack.i.h.bf16 %v1998_v17  ;;  %v1999_v21 = vunpack.i.l.bf16 %v1998_v17 }
 0x507   : > { %v1337_v24 = vsel %vm1335_vm9, %v1334_v22, %v2000_v20  ;;  %v1336_v25 = vsel %vm1335_vm9, %v1333_v23, %v1999_v21 }
 0x508   : > { %v1338_v26 = vpack.c.bf16 %v1337_v24, %v1336_v25 }
 0x50a   : > { %1909 = vmatmul.msk.bf16.vlgmr.msra.gmra.mxu2 %vm1375_vm11, %v1338_v26 }
 0x58d   : > { %v1388_v28 = vpop.f32.mrf.mxu2 }
 0x58e   : > { %v1389_v40 = vadd.f32 %v2003_v27, %v1388_v28 }
 0x590   : > { %v2438_v10 = vadd.f32 %v1389_v40, %v2257_v2 }
 0x592   : > { %v1397_v29 = vsel %vm626_vm1, %v2438_v10, 0.0 }
 0x593   : > { %1398 = vadd.xlane.f32.xlu0 %v1397_v29 }
 0x595   : > { %v1390_v30 = vpop.f32.mrf.mxu2 }
 0x596   : > { %v1391_v32 = vadd.f32 %v2003_v27, %v1390_v30 }
 0x598   : > { %v2443_v33 = vadd.f32 %v1391_v32, %v2261_v4 }
 0x59a   : > { %v1400_v34 = vsel %vm626_vm1, %v2443_v33, 0.0 }
 0x59b   : > { %1401 = vadd.xlane.f32.xlu2 %v1400_v34  ;;  %v1960_v34 = vld [vmem:[%s2244_s4 + $0x18] sm:$0xff] }
 0x59c   : > { %1621 = vmatpush.bf16.msrb.mxu0 %v1960_v34 }
 0x606   : > { %v1399_v35 = vpop.xlane.xlu0 %1398 }
 0x607   : > { %v1403_v37 = vmul.f32 %v1399_v35, %v2265_v12 }
 0x609   : > { %v1405_v2 = vsub.f32 %v2438_v10, %v1403_v37 }
 0x60b   : > { %v1407_v39 = vmul.f32 %v1405_v2, %v1405_v2 }
 0x60d   : > { %v1409_v41 = vsel %vm626_vm1, %v1407_v39, 0.0 }
 0x60e   : > { %v1402_v42 = vpop.xlane.xlu2 %1401  ;;  %1410 = vadd.xlane.f32.xlu2 %v1409_v41 }
 0x60f   : > { %v1404_v18 = vmul.f32 %v1402_v42, %v2265_v12 }
 0x611   : > { %v1406_v4 = vsub.f32 %v2443_v33, %v1404_v18 }
 0x613   : > { %v1408_v43 = vmul.f32 %v1406_v4, %v1406_v4 }
 0x615   : > { %v1412_v44 = vsel %vm626_vm1, %v1408_v43, 0.0 }
 0x616   : > { %1413 = vadd.xlane.f32.xlu2 %v1412_v44 }
 0x681   : > { %v1411_v46 = vpop.xlane.xlu2 %1410 }
 0x682   : > { %v1415_v48 = vmul.f32 %v1411_v46, %v2265_v12 }
 0x684   : > { %v1417_v49 = vadd.f32 1e-05, %v1415_v48 }
 0x686   : > { %2046 = vrsqrt.f32 %v1417_v49  ;;  %vm1425_vm5 = vweird.f32 %v1417_v49 }
 0x689   : > { %v1414_v51 = vpop.xlane.xlu2 %1413 }
 0x68a   : > { %v1416_v52 = vmul.f32 %v1414_v51, %v2265_v12  ;;  %v1958_v51 = vld [vmem:[%s2244_s4 + $0x8] sm:$0xff] }
 0x68c   : > { %v2047_v53 = vpop.eup %2046  ;;  %v1418_v54 = vadd.f32 1e-05, %v1416_v52 }
 0x68d   : > { %v1420_v38 = vmul.f32 %v2047_v53, %v1417_v49  ;;  %vm1426_vm10 = vweird.f32 %v2047_v53 }
 0x68e   : > { %2048 = vrsqrt.f32 %v1418_v54  ;;  %vm1427_vm6 = vmor %vm1425_vm5, %vm1426_vm10  ;;  %vm1435_vm8 = vweird.f32 %v1418_v54 }
 0x68f   : > { %v1421_v55 = vmul.f32 %v2047_v53, %v1420_v38 }
 0x691   : > { %v1422_v56 = vmul.f32 0.5, %v1421_v55 }
 0x693   : > { %v1423_v57 = vsub.f32 1.5, %v1422_v56  ;;  %v1957_v56 = vld [vmem:[%s2244_s4] sm:$0xff] }
 0x694   : > { %v2049_v3 = vpop.eup %2048 }
 0x695   : > { %v1424_v45 = vmul.f32 %v2047_v53, %v1423_v57  ;;  %v1430_v58 = vmul.f32 %v2049_v3, %v1418_v54  ;;  %vm1436_vm7 = vweird.f32 %v2049_v3 }
 0x696   : > { %vm1437_vm12 = vmor %vm1435_vm8, %vm1436_vm7 }
 0x697   : > { %v1431_v11 = vmul.f32 %v2049_v3, %v1430_v58  ;;  %v1428_v59 = vsel %vm1427_vm6, %v2047_v53, %v1424_v45 }
 0x698   : > { %v1439_v63 = vmul.f32 %v1428_v59, %v1405_v2 }
 0x699   : > { %v1432_v60 = vmul.f32 0.5, %v1431_v11 }
 0x69a   : > { %v1444_v5 = vmul.f32 %v2004_v62, %v1439_v63 }
 0x69b   : > { %v1433_v61 = vsub.f32 1.5, %v1432_v60 }
 0x69c   : > { %v1449_v9 = vadd.f32 %v2005_v1, %v1444_v5 }
 0x69d   : > { %v1434_v0 = vmul.f32 %v2049_v3, %v1433_v61 }
 0x69f   : > { %v1438_v31 = vsel %vm1437_vm12, %v2049_v3, %v1434_v0 }
 0x6a0   : > { %v1440_v6 = vmul.f32 %v1438_v31, %v1406_v4  ;;  %v1959_v4 = vld [vmem:[%s2244_s4 + $0x10] sm:$0xff] }
 0x6a1   : > { %1622 = vmatpush.bf16.msrb.mxu0 %v1959_v4 }
 0x6a2   : > { %v1445_v8 = vmul.f32 %v2004_v62, %v1440_v6 }
 0x6a4   : > { %v1450_v13 = vadd.f32 %v2005_v1, %v1445_v8 }
 0x6a5   : > { %1623 = vmatpush.bf16.msrb.mxu0 %v1958_v51 }
 0x6a6   : > { %v1451_v7 = vpack.c.bf16 %v1450_v13, %v1449_v9 }
 0x6a8   : > { %1918 = vmatmul.msk.bf16.vlgmr.msra.gmra.mxu3 %vm626_vm1, %v1451_v7 }
 0x6a9   : > { %1624 = vmatpush.bf16.msrb.mxu0 %v1957_v56 }
 0x72b   : > { %v1484_v15 = vpop.f32.mrf.mxu3 }
 0x72c   : > { %v2473_v16 = vadd.f32 %v2006_v14, %v1484_v15 }
 0x72e   : > { %v2476_v17 = vmul.f32 0.70710677, %v2473_v16 }
 0x730   : > { %v1493_v19 = vmul.f32 %v2476_v17, %v2476_v17 }
 0x732   : > { %v1494_v36 = vmin.f32 %v1493_v19, 16.0 }
 0x733   : > { %v1486_v20 = vpop.f32.mrf.mxu3 }
 0x734   : > { %v1495_v21 = vmul.f32 2.1237322e-06, %v1494_v36  ;;  %v1506_v22 = vmul.f32 3.8918573e-05, %v1494_v36  ;;  %v2480_v23 = vadd.f32 %v2006_v14, %v1486_v20 }
 0x736   : > { %v1496_v24 = vadd.f32 0.00028619796, %v1495_v21  ;;  %v1507_v25 = vadd.f32 0.001143296, %v1506_v22  ;;  %v2483_v26 = vmul.f32 0.70710677, %v2480_v23 }
 0x738   : > { %v1508_v27 = vmul.f32 %v1507_v25, %v1494_v36  ;;  %v1533_v28 = vmul.f32 %v2483_v26, %v2483_v26  ;;  %v1497_v40 = vmul.f32 %v1496_v24, %v1494_v36 }
 0x73a   : > { %v1509_v29 = vadd.f32 0.014752088, %v1508_v27  ;;  %v1534_v30 = vmin.f32 %v1533_v28, 16.0  ;;  %v1498_v2 = vadd.f32 0.0036580483, %v1497_v40 }
 0x73c   : > { %v1510_v32 = vmul.f32 %v1509_v29, %v1494_v36  ;;  %v1535_v35 = vmul.f32 2.1237322e-06, %v1534_v30  ;;  %v1546_v37 = vmul.f32 3.8918573e-05, %v1534_v30  ;;  %v1499_v46 = vmul.f32 %v1498_v2, %v1494_v36 }
 0x73e   : > { %v1511_v39 = vadd.f32 0.112945676, %v1510_v32  ;;  %v1536_v41 = vadd.f32 0.00028619796, %v1535_v35  ;;  %v1547_v42 = vadd.f32 0.001143296, %v1546_v37 }
 0x73f   : > { %v1500_v53 = vadd.f32 0.05243302, %v1499_v46 }
 0x740   : > { %v1512_v18 = vmul.f32 %v1511_v39, %v1494_v36  ;;  %v1537_v43 = vmul.f32 %v1536_v41, %v1534_v30  ;;  %v1548_v44 = vmul.f32 %v1547_v42, %v1534_v30  ;;  %v1489_v41 = vmul.f32 0.5, %v2473_v16 }
 0x741   : > { %v1501_v3 = vmul.f32 %v1500_v53, %v1494_v36  ;;  %v1490_v42 = vmul.f32 0.5, %v2480_v23 }
 0x742   : > { %v1513_v47 = vadd.f32 0.4994258, %v1512_v18  ;;  %v1538_v48 = vadd.f32 0.0036580483, %v1537_v43  ;;  %v1549_v49 = vadd.f32 0.014752088, %v1548_v44 }
 0x743   : > { %v1502_v60 = vadd.f32 0.18741608, %v1501_v3 }
 0x744   : > { %v1514_v50 = vmul.f32 %v1513_v47, %v1494_v36  ;;  %v1550_v52 = vmul.f32 %v1549_v49, %v1534_v30  ;;  %v1539_v38 = vmul.f32 %v1538_v48, %v1534_v30 }
 0x745   : > { %v1503_v31 = vmul.f32 %v1502_v60, %v1494_v36 }
 0x746   : > { %v1515_v54 = vadd.f32 1.0, %v1514_v50  ;;  %v1551_v55 = vadd.f32 0.112945676, %v1550_v52  ;;  %v1540_v45 = vadd.f32 0.05243302, %v1539_v38 }
 0x747   : > { %v1504_v13 = vadd.f32 1.1283791, %v1503_v31 }
 0x748   : > { %2050 = vrcp.f32 %v1515_v54  ;;  %v1552_v57 = vmul.f32 %v1551_v55, %v1534_v30  ;;  %v1541_v62 = vmul.f32 %v1540_v45, %v1534_v30  ;;  %v1527_v5 = vand.u32 2147483648, %v1515_v54 }
 0x749   : > { %v1525_v8 = vand.u32 2147483647, %v1515_v54  ;;  %vm1521_vm14 = vweird.f32 %v1515_v54  ;;  %v1505_v22 = vmul.f32 %v1504_v13, %v2476_v17 }
 0x74a   : > { %v1553_v58 = vadd.f32 0.4994258, %v1552_v57  ;;  %v1542_v6 = vadd.f32 0.18741608, %v1541_v62  ;;  %v1528_v15 = vor.u32 1.1754944e-38, %v1527_v5 }
 0x74b   : > { %vm1526_vm0 = vcmp.eq.f32.partialorder %v1525_v8, 8.507059e+37 }
 0x74c   : > { %v1554_v11 = vmul.f32 %v1553_v58, %v1534_v30  ;;  %v1543_v19 = vmul.f32 %v1542_v6, %v1534_v30 }
 0x74e   : > { %v2051_v59 = vpop.eup %2050  ;;  %v1555_v63 = vadd.f32 1.0, %v1554_v11  ;;  %v1544_v36 = vadd.f32 1.1283791, %v1543_v19 }
 0x74f   : > { %v1517_v61 = vmul.f32 %v2051_v59, %v1515_v54  ;;  %vm1522_vm13 = vweird.f32 %v2051_v59 }
 0x750   : > { %2052 = vrcp.f32 %v1555_v63  ;;  %vm1523_vm15 = vmor %vm1521_vm14, %vm1522_vm13  ;;  %v1567_v25 = vand.u32 2147483648, %v1555_v63  ;;  %v1565_v40 = vand.u32 2147483647, %v1555_v63  ;;  %vm1561_vm3 = vweird.f32 %v1555_v63 }
 0x751   : > { %v1518_v0 = vsub.f32 1.0, %v1517_v61  ;;  %v1545_v30 = vmul.f32 %v1544_v36, %v2483_v26  ;;  %v2007_v26 = vld [vmem:[%s611_s21] ss:$0 sm:$0xff]  ;;  %s2556_s21 = sld [smem:[#allocation9_spill]] (!%p1938_p5) }
 0x752   : > { %v1568_v32 = vor.u32 1.1754944e-38, %v1567_v25  ;;  %vm1566_vm9 = vcmp.eq.f32.partialorder %v1565_v40, 8.507059e+37 }
 0x753   : > { %v1519_v1 = vmul.f32 %v2051_v59, %v1518_v0 }
 0x755   : > { %v1520_v9 = vadd.f32 %v2051_v59, %v1519_v1 }
 0x756   : > { %v2053_v7 = vpop.eup %2052 }
 0x757   : > { %v1524_v14 = vsel %vm1523_vm15, %v2051_v59, %v1520_v9  ;;  %v1557_v20 = vmul.f32 %v2053_v7, %v1555_v63  ;;  %vm1562_vm2 = vweird.f32 %v2053_v7 }
 0x758   : > { %v1529_v21 = vsel %vm1526_vm0, %v1528_v15, %v1524_v14  ;;  %vm1563_vm4 = vmor %vm1561_vm3, %vm1562_vm2 }
 0x759   : > { %v1558_v24 = vsub.f32 1.0, %v1557_v20  ;;  %v1530_v27 = vmul.f32 %v1529_v21, %v1505_v22 }
 0x75b   : > { %v1559_v28 = vmul.f32 %v2053_v7, %v1558_v24  ;;  %v1919_v34 = vclamps-f32 %v1530_v27, 1.0 }
 0x75d   : > { %v1560_v29 = vadd.f32 %v2053_v7, %v1559_v28  ;;  %v1573_v17 = vadd.f32 1.0, %v1919_v34 }
 0x75f   : > { %v1564_v35 = vsel %vm1563_vm4, %v2053_v7, %v1560_v29  ;;  %v1575_v4 = vmul.f32 %v1573_v17, %v1489_v41 }
 0x760   : > { %v1569_v37 = vsel %vm1566_vm9, %v1568_v32, %v1564_v35 }
 0x761   : > { %v1570_v2 = vmul.f32 %v1569_v37, %v1545_v30 }
 0x763   : > { %v1920_v39 = vclamps-f32 %v1570_v2, 1.0 }
 0x765   : > { %v1574_v18 = vadd.f32 1.0, %v1920_v39 }
 0x767   : > { %v1576_v43 = vmul.f32 %v1574_v18, %v1490_v42 }
 0x769   : > { %v1577_v44 = vpack.c.bf16 %v1576_v43, %v1575_v4 }
 0x76b   : > { %1937 = vmatmul.msk.bf16.vlgmr.msrb.gmra.mxu0 %vm1375_vm11, %v1577_v44 }
 0x7e8   : > { %v1626_v46 = vpop.f32.mrf.mxu0 }
 0x7e9   : > { %v1627_v47 = vadd.f32 %v2007_v26, %v1626_v46 }
 0x7eb   : > { %v1631_v48 = vadd.f32 %v1627_v47, %v2438_v10 }
 0x7ed   : > { %1633 = vst.msk [vmem:[#allocation2] sm:$0xff] %vm626_vm1, %v1631_v48 }
 0x7f0   : > { %v1628_v16 = vpop.f32.mrf.mxu0 }
 0x7f1   : > { %v1629_v49 = vadd.f32 %v2007_v26, %v1628_v16  ;;  %1638 = sbr.rel (%p1938_p5) target bundleno = 2315 (0x90b), region = 84 }
 0x7f3   : > { %v1632_v23 = vadd.f32 %v1629_v49, %v2443_v33 }
 0x7f5   : > { %1634 = vst.msk [vmem:[#allocation2 + $0x8] sm:$0xff] %vm626_vm1, %v1632_v23 }
 0x7f6   : > { %v1641_v50 = vsel %vm626_vm1, %v1631_v48, 0.0  ;;  %v1644_v51 = vsel %vm626_vm1, %v1632_v23, 0.0  ;;  %v2054_v9 = vld [vmem:[%s2556_s21] ss:$0 sm:$0xff] }
 0x7f7   : > { %1642 = vadd.xlane.f32.xlu0 %v1641_v50  ;;  %v2055_v14 = vld [vmem:[%s2557_s25] ss:$0 sm:$0xff] }
 0x7ff   : > { %1645 = vadd.xlane.f32.xlu0 %v1644_v51 }
 0x86a   : > { %v1643_v52 = vpop.xlane.xlu0 %1642 }
 0x86b   : > { %v1647_v10 = vmul.f32 %v1643_v52, %v2265_v12 }
 0x86d   : > { %v1649_v53 = vsub.f32 %v1631_v48, %v1647_v10 }
 0x86f   : > { %v1651_v54 = vmul.f32 %v1649_v53, %v1649_v53 }
 0x871   : > { %v1653_v38 = vsel %vm626_vm1, %v1651_v54, 0.0 }
 0x872   : > { %1654 = vadd.xlane.f32.xlu1 %v1653_v38  ;;  %v1646_v33 = vpop.xlane.xlu0 %1645 }
 0x873   : > { %v1648_v55 = vmul.f32 %v1646_v33, %v2265_v12 }
 0x875   : > { %v1650_v56 = vsub.f32 %v1632_v23, %v1648_v55 }
 0x877   : > { %v1652_v57 = vmul.f32 %v1650_v56, %v1650_v56 }
 0x879   : > { %v1656_v3 = vsel %vm626_vm1, %v1652_v57, 0.0 }
 0x87a   : > { %1657 = vadd.xlane.f32.xlu1 %v1656_v3 }
 0x8e5   : > { %v1655_v45 = vpop.xlane.xlu1 %1654 }
 0x8e6   : > { %v1659_v58 = vmul.f32 %v1655_v45, %v2265_v12 }
 0x8e8   : > { %v1661_v11 = vadd.f32 1e-05, %v1659_v58 }
 0x8ea   : > { %2056 = vrsqrt.f32 %v1661_v11  ;;  %vm1669_vm10 = vweird.f32 %v1661_v11 }
 0x8ed   : > { %v1658_v59 = vpop.xlane.xlu1 %1657 }
 0x8ee   : > { %v1660_v60 = vmul.f32 %v1658_v59, %v2265_v12 }
 0x8f0   : > { %v2057_v61 = vpop.eup %2056  ;;  %v1662_v62 = vadd.f32 1e-05, %v1660_v60 }
 0x8f1   : > { %v1664_v63 = vmul.f32 %v2057_v61, %v1661_v11  ;;  %vm1670_vm11 = vweird.f32 %v2057_v61 }
 0x8f2   : > { %2058 = vrsqrt.f32 %v1662_v62  ;;  %vm1671_vm5 = vmor %vm1669_vm10, %vm1670_vm11  ;;  %vm1679_vm7 = vweird.f32 %v1662_v62 }
 0x8f3   : > { %v1665_v0 = vmul.f32 %v2057_v61, %v1664_v63 }
 0x8f5   : > { %v1666_v31 = vmul.f32 0.5, %v1665_v0 }
 0x8f7   : > { %v1667_v1 = vsub.f32 1.5, %v1666_v31 }
 0x8f8   : > { %v2059_v5 = vpop.eup %2058 }
 0x8f9   : > { %v1668_v6 = vmul.f32 %v2057_v61, %v1667_v1  ;;  %v1674_v8 = vmul.f32 %v2059_v5, %v1662_v62  ;;  %vm1680_vm6 = vweird.f32 %v2059_v5 }
 0x8fa   : > { %vm1681_vm8 = vmor %vm1679_vm7, %vm1680_vm6 }
 0x8fb   : > { %v1672_v13 = vsel %vm1671_vm5, %v2057_v61, %v1668_v6  ;;  %v1675_v7 = vmul.f32 %v2059_v5, %v1674_v8 }
 0x8fc   : > { %v1683_v12 = vmul.f32 %v1672_v13, %v1649_v53 }
 0x8fd   : > { %v1676_v15 = vmul.f32 0.5, %v1675_v7 }
 0x8fe   : > { %v1688_v19 = vmul.f32 %v2054_v9, %v1683_v12 }
 0x8ff   : > { %v1677_v20 = vsub.f32 1.5, %v1676_v15 }
 0x900   : > { %v1693_v21 = vadd.f32 %v2055_v14, %v1688_v19 }
 0x901   : > { %v1678_v22 = vmul.f32 %v2059_v5, %v1677_v20 }
 0x902   : > { %1695 = vst.msk [vmem:[#allocation3] sm:$0xff] %vm626_vm1, %v1693_v21 }
 0x903   : > { %v1682_v24 = vsel %vm1681_vm8, %v2059_v5, %v1678_v22 }
 0x904   : > { %v1684_v36 = vmul.f32 %v1682_v24, %v1650_v56 }
 0x906   : > { %v1689_v25 = vmul.f32 %v2054_v9, %v1684_v36 }
 0x908   : > { %v1694_v27 = vadd.f32 %v2055_v14, %v1689_v25 }
 0x90a   : > { %1696 = vst.msk [vmem:[#allocation3 + $0x8] sm:$0xff] %vm626_vm1, %v1694_v27 }
 0x90b PF: > { %p1965_p6 = scmp.eq.s32.totalorder %s2192_s30, 1  ;;  %s2108_s3 = smov [#allocation3]  }
 0x90c   : > { %s1702_s23 = sshll.u32 %s2108_s3, 4  ;;  %s2558_s28 = sld [smem:[#allocation11_spill]]  ;;  %s1703_s23 = int_to_ptr.vmem [resolvable:$true] %s1702_s23 }
 0x90d   : > { %s2109_s12 = smov 128   ;;  %s2110_s27 = smov 8  }
 0x912   : > { %s1704_s24 = sshll.u32 %s2558_s28, 4  ;;  %s1705_s24 = int_to_ptr.hbm [resolvable:$true] %s1704_s24 }
 0x913   : > { %1962 = dma.vmem_to_hbm [thread:$0]  (%p1965_p6), %s1703_s23, 256, %s1705_s24, [#allocation4], %s2109_s12, %s2109_s12, %s2110_s27  }
 0x914   : > { %2093 = dma.done.wait (%p1965_p6), [#allocation4], 256  }
 0x915   : > { %2095 = vsyncadd (%p1965_p6), [#allocation4], 4294967040 }
 0x916 PF: > { %s2559_s16 = sld [smem:[#allocation6_spill]] }
 0x91c   : > { %s25_s29 = sadd.s32 1, %s2559_s16  }
 0x91d   : > { %p22_p7 = scmp.ge.s32.totalorder %s25_s29, 4  }
 0x91f   :  { %24 = sbr.rel (!%p22_p7) target bundleno = 7 (0x7), region = 141 }
 0x924   :  { %1721 = vsyncpa [#allocation4], 1 }
 0x925   :  { %1723 = vsyncpa [#allocation4 + $0x1], 1 }

</bundles_post_ra>
